<compile_context>
chip_gen: v6e
topology: v6e:2x2x1
jax: 0.10.0
libtpu: 0.0.40
codegen_flags: <defaults>
</compile_context>

<pallas_src>
import math

import jax
import jax.numpy as jnp
from jax.experimental import pallas as pl
from jax.experimental.pallas import tpu as pltpu

# Problem sizes (small, consistent with a Box obs/act space).
OBS_DIM = 16   # observation_space.shape[0]
ACT_DIM = 4    # action_space.shape[-1]
HIDDEN = 32    # ac_kwargs.pi.hidden_sizes == ac_kwargs.val.hidden_sizes == [32, 32]
ACT_MIN = -1.0
ACT_MAX = 1.0
_LOG_2PI = math.log(2.0 * math.pi)

B = 128        # batch
BT = 128       # batch tile: single grid step (see review); raise toward 512-1024 for big batches
LANES = 128

# --- packed weight slab (W_ROWS, 128) row offsets -----------------------------
R1 = 0            # rows  0:16  lanes 0:32 -> w1,   lanes 32:64 -> wc1_obs   (fused layer-1)
R1A = 16          # rows 16:24  lanes 32:64 -> wc1_act (4 real rows, padded to 8)
R2 = 24           # rows 24:56  lanes 0:32 -> w2,   lanes 32:64 -> wc2
R3 = 56           # rows 56:88  lanes 0:4  -> w3
W_ROWS = 88

# --- packed bias/scalar slab (8, 128) row offsets ------------------------------
ROW_B1 = 0        # lanes 0:32 b1, lanes 32:64 bc1
ROW_B2 = 1        # lanes 0:32 b2, lanes 32:64 bc2
ROW_B3 = 2        # lanes 0:4  b3
ROW_STD = 3       # lanes 0:4  exp(log_std)                (precomputed)
ROW_WC3 = 4       # lanes 0:32 wc3 row (for the VPU/XLU q-reduce)
ROW_BC3 = 5       # lane  0    bc3
ROW_LPC = 6       # lane  0    -sum(log_std) - 0.5*D*log(2*pi)  (precomputed)
B_ROWS = 8

# output slab lane layout (lanes 10:127 are unwritten/garbage — wrapper-only consumer)
_O_RAW = 0                       # lanes 0:4
_O_ACT = ACT_DIM                 # lanes 4:8
_O_VAL = 2 * ACT_DIM             # lane  8
_O_LOGP = 2 * ACT_DIM + 1        # lane  9
_O_USED = 2 * ACT_DIM + 2        # 10 useful lanes


def _actor_q_critic_kernel(obs_ref, noise_ref, w_ref, b_ref, out_ref):
    obs = obs_ref[...]                                 # (BT, 16)
    noise = noise_ref[...]                             # (BT, 4)
    bs = b_ref[...]                                    # (8, 128): one aligned vreg-set load

    std = bs[ROW_STD:ROW_STD + 1, :ACT_DIM]            # (1, 4)  precomputed exp(log_std)
    logp_const = bs[ROW_LPC:ROW_LPC + 1, 0:1]          # (1, 1)

    # logp via the z == eps identity (log-prob of the UNCLIPPED raw action, matching
    # GaussianLearningActor.predict) — independent of the matmul chain.
    logp = logp_const - 0.5 * jnp.sum(noise * noise, axis=-1, keepdims=True)   # (BT, 1)

    # ---- Fused layer-1: obs @ [w1 | wc1_obs | 0] + [b1 | bc1 | 0]  -> (BT, 128)
    h1_full = (jnp.dot(obs, w_ref[R1:R1 + OBS_DIM, :],
                       preferred_element_type=jnp.float32)
               + bs[ROW_B1:ROW_B1 + 1, :])
    h_a = jnp.tanh(h1_full[:, :HIDDEN])                # actor hidden-1

    # ---- Actor L2 / L3 -> mean (full-lane RHS reads; slice the results)
    h2_full = (jnp.dot(h_a, w_ref[R2:R2 + HIDDEN, :],
                       preferred_element_type=jnp.float32)
               + bs[ROW_B2:ROW_B2 + 1, :])
    h_a = jnp.tanh(h2_full[:, :HIDDEN])
    mean_full = (jnp.dot(h_a, w_ref[R3:R3 + HIDDEN, :],
                         preferred_element_type=jnp.float32)
                 + bs[ROW_B3:ROW_B3 + 1, :])
    mean = mean_full[:, :ACT_DIM]

    # Reparameterized sample and clipped action.
    raw = mean + std * noise
    act = jnp.clip(raw, ACT_MIN, ACT_MAX)

    # ---- Q critic: add the action contribution (lanes 32:64) to the fused-L1 obs part.
    act_pad = jnp.concatenate([act, jnp.zeros_like(act)], axis=-1)   # (BT, 8): K padded to 8
    act_contrib = jnp.dot(act_pad, w_ref[R1A:R1A + 8, :],
                          preferred_element_type=jnp.float32)        # useful lanes 32:64
    hc = jnp.tanh((h1_full + act_contrib)[:, HIDDEN:2 * HIDDEN])
    hc2_full = (jnp.dot(hc, w_ref[R2:R2 + HIDDEN, :],
                        preferred_element_type=jnp.float32)
                + bs[ROW_B2:ROW_B2 + 1, :])
    hc = jnp.tanh(hc2_full[:, HIDDEN:2 * HIDDEN])
    # N=1 output matmul replaced by VPU multiply + XLU cross-lane sum (keeps the MXU free).
    q = (jnp.sum(hc * bs[ROW_WC3:ROW_WC3 + 1, :HIDDEN], axis=-1, keepdims=True)
         + bs[ROW_BC3:ROW_BC3 + 1, 0:1])

    # ---- Direct narrow stores; no full-tile zero-init (lanes 10:127 are never consumed).
    out_ref[:, _O_RAW:_O_RAW + ACT_DIM] = raw
    out_ref[:, _O_ACT:_O_ACT + ACT_DIM] = act
    out_ref[:, _O_VAL:_O_VAL + 1] = q
    out_ref[:, _O_LOGP:_O_LOGP + 1] = logp


def pack_params(params):
    """Pack the 14 parameter tensors into two lane-dense slabs (done once, host side)."""
    w = jnp.zeros((W_ROWS, LANES), jnp.float32)
    w = w.at[R1:R1 + OBS_DIM, 0:HIDDEN].set(params["w1"])
    w = w.at[R1:R1 + OBS_DIM, HIDDEN:2 * HIDDEN].set(params["wc1_obs"])
    w = w.at[R1A:R1A + ACT_DIM, HIDDEN:2 * HIDDEN].set(params["wc1_act"])
    w = w.at[R2:R2 + HIDDEN, 0:HIDDEN].set(params["w2"])
    w = w.at[R2:R2 + HIDDEN, HIDDEN:2 * HIDDEN].set(params["wc2"])
    w = w.at[R3:R3 + HIDDEN, 0:ACT_DIM].set(params["w3"])

    b = jnp.zeros((B_ROWS, LANES), jnp.float32)
    b = b.at[ROW_B1, 0:HIDDEN].set(params["b1"][0])
    b = b.at[ROW_B1, HIDDEN:2 * HIDDEN].set(params["bc1"][0])
    b = b.at[ROW_B2, 0:HIDDEN].set(params["b2"][0])
    b = b.at[ROW_B2, HIDDEN:2 * HIDDEN].set(params["bc2"][0])
    b = b.at[ROW_B3, 0:ACT_DIM].set(params["b3"][0])
    b = b.at[ROW_STD, 0:ACT_DIM].set(jnp.exp(params["log_std"][0]))
    b = b.at[ROW_WC3, 0:HIDDEN].set(params["wc3"][:, 0])
    b = b.at[ROW_BC3, 0].set(params["bc3"][0, 0])
    b = b.at[ROW_LPC, 0].set(-jnp.sum(params["log_std"]) - 0.5 * ACT_DIM * _LOG_2PI)
    return w, b


def actor_q_critic_step(obs, noise, wslab, bslab):
    """Pallas-backed equivalent of ActorQCritic.step(obs, deterministic=False).

    Returns (raw_action, action, value, logp_a).
    """
    batch = obs.shape[0]
    # TODO(synk): variable batch sizes would need pl.cdiv + tail masking.
    assert batch % BT == 0, "batch must be a multiple of the batch tile"

    out = pl.pallas_call(
        _actor_q_critic_kernel,
        out_shape=jax.ShapeDtypeStruct((batch, LANES), jnp.float32),
        grid=(batch // BT,),
        in_specs=[
            pl.BlockSpec((BT, OBS_DIM), lambda i: (i, 0)),     # obs: full last dim (16)
            pl.BlockSpec((BT, ACT_DIM), lambda i: (i, 0)),     # noise: full last dim (4)
            pl.BlockSpec((W_ROWS, LANES), lambda i: (0, 0)),   # weights: DMA once, VMEM-resident
            pl.BlockSpec((B_ROWS, LANES), lambda i: (0, 0)),   # biases/scalars: DMA once
        ],
        out_specs=pl.BlockSpec((BT, LANES), lambda i: (i, 0)),
        compiler_params=pltpu.CompilerParams(
            dimension_semantics=("arbitrary",)),               # single grid step at this size
    )(obs, noise, wslab, bslab)

    packed = out[:, :_O_USED]           # one pass over the useful 10 lanes
    raw = packed[:, _O_RAW:_O_RAW + ACT_DIM]
    act = packed[:, _O_ACT:_O_ACT + ACT_DIM]
    val = packed[:, _O_VAL]
    logp = packed[:, _O_LOGP]
    return raw, act, val, logp


def init_params(key):
    """Deterministic synthetic parameters (shapes implied by the module __init__)."""
    ks = jax.random.split(key, 12)

    def lin(k, fan_in, fan_out):
        bound = 1.0 / math.sqrt(fan_in)
        return jax.random.uniform(k, (fan_in, fan_out), jnp.float32, -bound, bound)

    params = {
        # actor pi: obs -> H -> H -> act_dim
        "w1": lin(ks[0], OBS_DIM, HIDDEN),
        "b1": jnp.zeros((1, HIDDEN), jnp.float32),
        "w2": lin(ks[1], HIDDEN, HIDDEN),
        "b2": jnp.zeros((1, HIDDEN), jnp.float32),
        "w3": lin(ks[2], HIDDEN, ACT_DIM),
        "b3": jnp.zeros((1, ACT_DIM), jnp.float32),
        "log_std": jnp.full((1, ACT_DIM), -0.5, jnp.float32),
        # critic Q: [obs ; act] -> H -> H -> 1  (first-layer weight split)
        "wc1_obs": lin(ks[3], OBS_DIM + ACT_DIM, HIDDEN)[:OBS_DIM, :],
        "wc1_act": lin(ks[3], OBS_DIM + ACT_DIM, HIDDEN)[OBS_DIM:, :],
        "bc1": jnp.zeros((1, HIDDEN), jnp.float32),
        "wc2": lin(ks[4], HIDDEN, HIDDEN),
        "bc2": jnp.zeros((1, HIDDEN), jnp.float32),
        "wc3": lin(ks[5], HIDDEN, 1),
        "bc3": jnp.zeros((1, 1), jnp.float32),
    }
    return params


if __name__ == "__main__":
    key = jax.random.PRNGKey(0)
    k_obs, k_noise, k_params = jax.random.split(key, 3)

    obs = jax.random.normal(k_obs, (B, OBS_DIM), jnp.float32)
    # eps for dist.rsample(); passed in so the kernel stays deterministic.
    noise = jax.random.normal(k_noise, (B, ACT_DIM), jnp.float32)
    params = init_params(k_params)
    wslab, bslab = pack_params(params)   # packed once, reused across steps

    raw_action, action, value, logp_a = jax.block_until_ready(
        actor_q_critic_step(obs, noise, wslab, bslab)
    )

    # Pure-JAX reference check of the same math.
    h = jnp.tanh(obs @ params["w1"] + params["b1"])
    h = jnp.tanh(h @ params["w2"] + params["b2"])
    mean = h @ params["w3"] + params["b3"]
    std = jnp.exp(params["log_std"])
    raw_ref = mean + std * noise
    act_ref = jnp.clip(raw_ref, ACT_MIN, ACT_MAX)
    z = (raw_ref - mean) / std
    logp_ref = jnp.sum(-0.5 * z * z - params["log_std"] - 0.5 * _LOG_2PI, axis=-1)
    hc = jnp.tanh(obs @ params["wc1_obs"] + act_ref @ params["wc1_act"] + params["bc1"])
    hc = jnp.tanh(hc @ params["wc2"] + params["bc2"])
    val_ref = (hc @ params["wc3"] + params["bc3"])[:, 0]

    assert jnp.allclose(raw_action, raw_ref, atol=1e-5)
    assert jnp.allclose(action, act_ref, atol=1e-5)
    # value / logp use reassociated math (fused L1 add order, z == eps identity,
    # host-precomputed logp constant) -> slightly looser tolerance than bit-level.
    assert jnp.allclose(value, val_ref, atol=1e-4, rtol=1e-4)
    assert jnp.allclose(logp_a, logp_ref, atol=1e-4, rtol=1e-4)

    print("KERNEL_OK")
</pallas_src>

<mosaic_0001>
module attributes {stable_mosaic.version = 11 : i64} {
  func.func @_actor_q_critic_kernel(%arg0: i32, %arg1: memref<128x16xf32, #tpu.memory_space<vmem>>, %arg2: memref<128x4xf32, #tpu.memory_space<vmem>>, %arg3: memref<88x128xf32, #tpu.memory_space<vmem>>, %arg4: memref<8x128xf32, #tpu.memory_space<vmem>>, %arg5: memref<128x128xf32, #tpu.memory_space<vmem>>) attributes {dimension_semantics = [#tpu.dimension_semantics<arbitrary>], iteration_bounds = array<i64: 1>, scalar_prefetch = 0 : i64, scratch_operands = 0 : i64, tpu.core_type = #tpu.core_type<tc>, window_params = [{transform_indices = @transform_0, window_bounds = array<i64: 128, 16>}, {transform_indices = @transform_1, window_bounds = array<i64: 128, 4>}, {pipeline_mode = #tpu.pipeline_mode<synchronous>, transform_indices = @transform_2, window_bounds = array<i64: 88, 128>}, {pipeline_mode = #tpu.pipeline_mode<synchronous>, transform_indices = @transform_3, window_bounds = array<i64: 8, 128>}, {transform_indices = @transform_4, window_bounds = array<i64: 128, 128>}]} {
    %c0 = arith.constant 0 : index
    %c0_0 = arith.constant 0 : index
    %0 = vector.load %arg1[%c0, %c0_0] : memref<128x16xf32, #tpu.memory_space<vmem>>, vector<128x16xf32>
    %c0_1 = arith.constant 0 : index
    %c0_2 = arith.constant 0 : index
    %1 = vector.load %arg2[%c0_1, %c0_2] : memref<128x4xf32, #tpu.memory_space<vmem>>, vector<128x4xf32>
    %c0_3 = arith.constant 0 : index
    %c0_4 = arith.constant 0 : index
    %2 = vector.load %arg4[%c0_3, %c0_4] : memref<8x128xf32, #tpu.memory_space<vmem>>, vector<8x128xf32>
    %3 = vector.extract_strided_slice %2 {offsets = [3, 0], sizes = [1, 4], strides = [1, 1]} : vector<8x128xf32> to vector<1x4xf32>
    %4 = vector.extract_strided_slice %2 {offsets = [6, 0], sizes = [1, 1], strides = [1, 1]} : vector<8x128xf32> to vector<1x1xf32>
    %5 = arith.mulf %1, %1 : vector<128x4xf32>
    %cst = arith.constant dense<0.000000e+00> : vector<128xf32>
    %6 = vector.multi_reduction <add>, %5, %cst [1] : vector<128x4xf32> to vector<128xf32>
    %7 = vector.shape_cast %6 : vector<128xf32> to vector<128x1xf32>
    %cst_5 = arith.constant 5.000000e-01 : f32
    %8 = vector.broadcast %cst_5 : f32 to vector<128x1xf32>
    %9 = arith.mulf %8, %7 : vector<128x1xf32>
    %10 = vector.broadcast %4 : vector<1x1xf32> to vector<128x1xf32>
    %11 = arith.subf %10, %9 : vector<128x1xf32>
    %c0_6 = arith.constant 0 : index
    %c0_7 = arith.constant 0 : index
    %12 = vector.load %arg3[%c0_6, %c0_7] : memref<88x128xf32, #tpu.memory_space<vmem>>, vector<16x128xf32>
    %cst_8 = arith.constant dense<0.000000e+00> : vector<128x128xf32>
    %13 = tpu.matmul %0, %12, %cst_8 {dimension_numbers = #tpu.dot_dimension_numbers<[1], [0], [0], [1], [0, 0, 1, 1], [], []>} : vector<128x16xf32>, vector<16x128xf32>, vector<128x128xf32> -> vector<128x128xf32>
    %14 = vector.extract_strided_slice %2 {offsets = [0, 0], sizes = [1, 128], strides = [1, 1]} : vector<8x128xf32> to vector<1x128xf32>
    %15 = vector.broadcast %14 : vector<1x128xf32> to vector<128x128xf32>
    %16 = arith.addf %13, %15 : vector<128x128xf32>
    %17 = vector.extract_strided_slice %16 {offsets = [0, 0], sizes = [128, 32], strides = [1, 1]} : vector<128x128xf32> to vector<128x32xf32>
    %18 = math.tanh %17 : vector<128x32xf32>
    %c24 = arith.constant 24 : index
    %c0_9 = arith.constant 0 : index
    %19 = vector.load %arg3[%c24, %c0_9] : memref<88x128xf32, #tpu.memory_space<vmem>>, vector<32x128xf32>
    %cst_10 = arith.constant dense<0.000000e+00> : vector<128x128xf32>
    %20 = tpu.matmul %18, %19, %cst_10 {dimension_numbers = #tpu.dot_dimension_numbers<[1], [0], [0], [1], [0, 0, 1, 1], [], []>} : vector<128x32xf32>, vector<32x128xf32>, vector<128x128xf32> -> vector<128x128xf32>
    %21 = vector.extract_strided_slice %2 {offsets = [1, 0], sizes = [1, 128], strides = [1, 1]} : vector<8x128xf32> to vector<1x128xf32>
    %22 = vector.broadcast %21 : vector<1x128xf32> to vector<128x128xf32>
    %23 = arith.addf %20, %22 : vector<128x128xf32>
    %24 = vector.extract_strided_slice %23 {offsets = [0, 0], sizes = [128, 32], strides = [1, 1]} : vector<128x128xf32> to vector<128x32xf32>
    %25 = math.tanh %24 : vector<128x32xf32>
    %c56 = arith.constant 56 : index
    %c0_11 = arith.constant 0 : index
    %26 = vector.load %arg3[%c56, %c0_11] : memref<88x128xf32, #tpu.memory_space<vmem>>, vector<32x128xf32>
    %cst_12 = arith.constant dense<0.000000e+00> : vector<128x128xf32>
    %27 = tpu.matmul %25, %26, %cst_12 {dimension_numbers = #tpu.dot_dimension_numbers<[1], [0], [0], [1], [0, 0, 1, 1], [], []>} : vector<128x32xf32>, vector<32x128xf32>, vector<128x128xf32> -> vector<128x128xf32>
    %28 = vector.extract_strided_slice %2 {offsets = [2, 0], sizes = [1, 128], strides = [1, 1]} : vector<8x128xf32> to vector<1x128xf32>
    %29 = vector.broadcast %28 : vector<1x128xf32> to vector<128x128xf32>
    %30 = arith.addf %27, %29 : vector<128x128xf32>
    %31 = vector.extract_strided_slice %30 {offsets = [0, 0], sizes = [128, 4], strides = [1, 1]} : vector<128x128xf32> to vector<128x4xf32>
    %32 = vector.broadcast %3 : vector<1x4xf32> to vector<128x4xf32>
    %33 = arith.mulf %32, %1 : vector<128x4xf32>
    %34 = arith.addf %31, %33 : vector<128x4xf32>
    %cst_13 = arith.constant -1.000000e+00 : f32
    %cst_14 = arith.constant 1.000000e+00 : f32
    %35 = vector.broadcast %cst_13 : f32 to vector<128x4xf32>
    %36 = arith.maximumf %35, %34 : vector<128x4xf32>
    %37 = vector.broadcast %cst_14 : f32 to vector<128x4xf32>
    %38 = arith.minimumf %37, %36 : vector<128x4xf32>
    %cst_15 = arith.constant 0.000000e+00 : f32
    %39 = vector.broadcast %cst_15 : f32 to vector<128x4xf32>
    %40 = tpu.concatenate %38, %39 in 1 : vector<128x4xf32>, vector<128x4xf32> -> vector<128x8xf32>
    %c16 = arith.constant 16 : index
    %c0_16 = arith.constant 0 : index
    %41 = vector.load %arg3[%c16, %c0_16] : memref<88x128xf32, #tpu.memory_space<vmem>>, vector<8x128xf32>
    %cst_17 = arith.constant dense<0.000000e+00> : vector<128x128xf32>
    %42 = tpu.matmul %40, %41, %cst_17 {dimension_numbers = #tpu.dot_dimension_numbers<[1], [0], [0], [1], [0, 0, 1, 1], [], []>} : vector<128x8xf32>, vector<8x128xf32>, vector<128x128xf32> -> vector<128x128xf32>
    %43 = arith.addf %16, %42 : vector<128x128xf32>
    %44 = vector.extract_strided_slice %43 {offsets = [0, 32], sizes = [128, 32], strides = [1, 1]} : vector<128x128xf32> to vector<128x32xf32>
    %45 = math.tanh %44 : vector<128x32xf32>
    %c24_18 = arith.constant 24 : index
    %c0_19 = arith.constant 0 : index
    %46 = vector.load %arg3[%c24_18, %c0_19] : memref<88x128xf32, #tpu.memory_space<vmem>>, vector<32x128xf32>
    %cst_20 = arith.constant dense<0.000000e+00> : vector<128x128xf32>
    %47 = tpu.matmul %45, %46, %cst_20 {dimension_numbers = #tpu.dot_dimension_numbers<[1], [0], [0], [1], [0, 0, 1, 1], [], []>} : vector<128x32xf32>, vector<32x128xf32>, vector<128x128xf32> -> vector<128x128xf32>
    %48 = vector.extract_strided_slice %2 {offsets = [1, 0], sizes = [1, 128], strides = [1, 1]} : vector<8x128xf32> to vector<1x128xf32>
    %49 = vector.broadcast %48 : vector<1x128xf32> to vector<128x128xf32>
    %50 = arith.addf %47, %49 : vector<128x128xf32>
    %51 = vector.extract_strided_slice %50 {offsets = [0, 32], sizes = [128, 32], strides = [1, 1]} : vector<128x128xf32> to vector<128x32xf32>
    %52 = math.tanh %51 : vector<128x32xf32>
    %53 = vector.extract_strided_slice %2 {offsets = [4, 0], sizes = [1, 32], strides = [1, 1]} : vector<8x128xf32> to vector<1x32xf32>
    %54 = vector.broadcast %53 : vector<1x32xf32> to vector<128x32xf32>
    %55 = arith.mulf %52, %54 : vector<128x32xf32>
    %cst_21 = arith.constant dense<0.000000e+00> : vector<128xf32>
    %56 = vector.multi_reduction <add>, %55, %cst_21 [1] : vector<128x32xf32> to vector<128xf32>
    %57 = vector.shape_cast %56 : vector<128xf32> to vector<128x1xf32>
    %58 = vector.extract_strided_slice %2 {offsets = [5, 0], sizes = [1, 1], strides = [1, 1]} : vector<8x128xf32> to vector<1x1xf32>
    %59 = vector.broadcast %58 : vector<1x1xf32> to vector<128x1xf32>
    %60 = arith.addf %57, %59 : vector<128x1xf32>
    %c0_22 = arith.constant 0 : index
    %c0_23 = arith.constant 0 : index
    %61 = vector.load %arg5[%c0_22, %c0_23] : memref<128x128xf32, #tpu.memory_space<vmem>>, vector<128x4xf32>
    tpu.vector_store %arg5[%c0_22, %c0_23], %34 {strides = array<i32>} : memref<128x128xf32, #tpu.memory_space<vmem>>, vector<128x4xf32>,
    %c0_24 = arith.constant 0 : index
    %c4 = arith.constant 4 : index
    %62 = vector.load %arg5[%c0_24, %c4] : memref<128x128xf32, #tpu.memory_space<vmem>>, vector<128x4xf32>
    tpu.vector_store %arg5[%c0_24, %c4], %38 {strides = array<i32>} : memref<128x128xf32, #tpu.memory_space<vmem>>, vector<128x4xf32>,
    %c0_25 = arith.constant 0 : index
    %c8 = arith.constant 8 : index
    %63 = vector.load %arg5[%c0_25, %c8] : memref<128x128xf32, #tpu.memory_space<vmem>>, vector<128x1xf32>
    tpu.vector_store %arg5[%c0_25, %c8], %60 {strides = array<i32>} : memref<128x128xf32, #tpu.memory_space<vmem>>, vector<128x1xf32>,
    %c0_26 = arith.constant 0 : index
    %c9 = arith.constant 9 : index
    %64 = vector.load %arg5[%c0_26, %c9] : memref<128x128xf32, #tpu.memory_space<vmem>>, vector<128x1xf32>
    tpu.vector_store %arg5[%c0_26, %c9], %11 {strides = array<i32>} : memref<128x128xf32, #tpu.memory_space<vmem>>, vector<128x1xf32>,
    return
  }
  func.func @transform_0(%arg0: i32) -> (i32, i32) {
    %c0_i32 = arith.constant 0 : i32
    %c0_i32_0 = arith.constant 0 : i32
    return %arg0, %c0_i32 : i32, i32
  }
  func.func @transform_1(%arg0: i32) -> (i32, i32) {
    %c0_i32 = arith.constant 0 : i32
    %c0_i32_0 = arith.constant 0 : i32
    return %arg0, %c0_i32 : i32, i32
  }
  func.func @transform_2(%arg0: i32) -> (i32, i32) {
    %c0_i32 = arith.constant 0 : i32
    %c0_i32_0 = arith.constant 0 : i32
    %c0_i32_1 = arith.constant 0 : i32
    return %c0_i32, %c0_i32_0 : i32, i32
  }
  func.func @transform_3(%arg0: i32) -> (i32, i32) {
    %c0_i32 = arith.constant 0 : i32
    %c0_i32_0 = arith.constant 0 : i32
    %c0_i32_1 = arith.constant 0 : i32
    return %c0_i32, %c0_i32_0 : i32, i32
  }
  func.func @transform_4(%arg0: i32) -> (i32, i32) {
    %c0_i32 = arith.constant 0 : i32
    %c0_i32_0 = arith.constant 0 : i32
    return %arg0, %c0_i32 : i32, i32
  }
}

</mosaic_0001>

<bundles_post_ra>
// kernel: tpu_custom_call.1
= control target key start
LH: loop header
LB: loop body
LE: loop exit
PB: predicated region body
PF: predicated region fallthrough
CT: control target
= control target key end

     0   :  { %vm158_vm0 = vcmask 130048   ;;  %s3237_s0 = inlined_call_operand.vmem [shape: f32[128,16], index: 0, kind: input, shape index: {}]   ;;  %s3238_s1 = inlined_call_operand.vmem [shape: f32[128,4], index: 1, kind: input, shape index: {}]   ;;  %s3239_s2 = inlined_call_operand.vmem [shape: f32[88,128], index: 2, kind: input, shape index: {}]   ;;  %s3240_s3 = inlined_call_operand.vmem [shape: f32[8,128], index: 3, kind: input, shape index: {}]   ;;  %s3241_s4 = inlined_call_operand.hbm [shape: f32[128,128], index: 4, kind: output, shape index: {}]  }
   0x1   :  { %v153_v0 = vld [vmem:[%s3239_s2 + $0x8] sm:$0xff]  ;;  %v152_v1 = vld [vmem:[%s3239_s2] sm:$0xff]  ;;  %v20_v4 = vld [vmem:[%s3237_s0 + $0x10] sm:$0xff] }
   0x2   :  { %v18_v2 = vld [vmem:[%s3237_s0] sm:$0xff]  ;;  %1961 = vmatprep.subr.mxu0 %v153_v0  ;;  %v19_v3 = vld [vmem:[%s3237_s0 + $0x8] sm:$0xff]  ;;  %2111 = vmatprep.subr.mxu1 %v153_v0  ;;  %v28_v7 = vld [vmem:[%s3237_s0 + $0x50] sm:$0xff] }
   0x3   :  { %1965 = vmatprep.mubr.msk.f32.mxu0 %vm158_vm0, %v18_v2  ;;  %1962 = vmatpush3.msra.mxu0 %v153_v0  ;;  %v26_v5 = vld [vmem:[%s3237_s0 + $0x40] sm:$0xff]  ;;  %v27_v6 = vld [vmem:[%s3237_s0 + $0x48] sm:$0xff]  ;;  %v21_v8 = vld [vmem:[%s3237_s0 + $0x18] sm:$0xff] }
   0x4   :  { %1963 = vmatprep.subr.mxu0 %v152_v1  ;;  %2113 = vmatpush3.msra.mxu1 %v153_v0 }
   0x5   :  { %1964 = vmatpush3.msra.mxu0 %v152_v1  ;;  %2112 = vmatprep.subr.mxu1 %v152_v1 }
   0x6   :  { %1966 = vmatmul.mubr.msk.f32.vlgmr.msra.gmra.mxu0 %vm158_vm0, %v19_v3  ;;  %2114 = vmatpush3.msra.mxu1 %v152_v1 }
   0x7   :  { %1968 = vmatprep.mubr.msk.f32.mxu0 %vm158_vm0, %v20_v4  ;;  %1977 = vmatprep.mubr.msk.f32.mxu1 %vm158_vm0, %v26_v5 }
   0x8   :  { %9 = vsyncpa [#allocation3], 0  ;;  %v22_v9 = vld [vmem:[%s3237_s0 + $0x20] sm:$0xff]  ;;  %1978 = vmatmul.mubr.msk.f32.vlgmr.msra.gmra.mxu1 %vm158_vm0, %v27_v6  ;;  %v29_v10 = vld [vmem:[%s3237_s0 + $0x58] sm:$0xff]  ;;  %v132_v22 = vlaneseq  ;;  %vm376_vm1 = vcmask 261120   ;;  %vm67_vm2 = vcmask 31744  }
   0x9   :  { %1980 = vmatprep.mubr.msk.f32.mxu1 %vm158_vm0, %v28_v7  ;;  %v30_v11 = vld [vmem:[%s3237_s0 + $0x60] sm:$0xff]  ;;  %v23_v12 = vld [vmem:[%s3237_s0 + $0x28] sm:$0xff]  ;;  %v24_v13 = vld [vmem:[%s3237_s0 + $0x30] sm:$0xff]  ;;  %vm872_vm3 = vcmask 64512   ;;  %s2274_s21 = smov 32   ;;  %s2275_s22 = smov 4  }
   0xa   :  { %1969 = vmatmul.mubr.msk.f32.gmra.mxu0 %vm158_vm0, %v21_v8  ;;  %v31_v14 = vld [vmem:[%s3237_s0 + $0x68] sm:$0xff]  ;;  %v32_v15 = vld [vmem:[%s3237_s0 + $0x70] sm:$0xff]  ;;  %v25_v16 = vld [vmem:[%s3237_s0 + $0x38] sm:$0xff]  ;;  %v2403_v23 = vshrl.u32 %v132_v22, 7  ;;  %s2276_s25 = smov 9   ;;  %vm1575_vm4 = vcmask 64544  }
   0xb   :  { %1971 = vmatprep.mubr.msk.f32.mxu0 %vm158_vm0, %v22_v9  ;;  %v33_v17 = vld [vmem:[%s3237_s0 + $0x78] sm:$0xff]  ;;  %v2378_v18 = vld [vmem:[%s3239_s2 + $0x30] sm:$0xff]  ;;  %v2385_v19 = vld [vmem:[%s3239_s2 + $0x28] sm:$0xff]  ;;  %vm1656_vm5 = vcmask 72768   ;;  %vm1737_vm6 = vcmask 80968   ;;  %s2278_s26 = smov [#allocation2]  }
   0xc   :  { %1981 = vmatmul.mubr.msk.f32.gmra.mxu1 %vm158_vm0, %v29_v10  ;;  %1989 = vmatprep.subr.mxu1 %v2378_v18  ;;  %v2392_v20 = vld [vmem:[%s3239_s2 + $0x20] sm:$0xff]  ;;  %v2399_v21 = vld [vmem:[%s3239_s2 + $0x18] sm:$0xff]  ;;  %v156_v24 = vsub.s32 0, %v2403_v23  ;;  %s1759_s27 = sshll.u32 %s2278_s26, 4  ;;  %s1760_s27 = int_to_ptr.vmem [resolvable:$true] %s1759_s27 }
   0xd   :  { %1983 = vmatprep.mubr.msk.f32.mxu1 %vm158_vm0, %v30_v11  ;;  %1990 = vmatpush3.msra.mxu1 %v2378_v18  ;;  %v2409_v25 = vld [vmem:[%s3240_s3] sm:$0xff]  ;;  %v589_v11 = vld [vmem:[%s3239_s2 + $0x50] sm:$0xff]  ;;  %s2251_s28 = scalar_lea.vmem %s1760_s27, 2048  ;;  %p2256_p1 = scmp.lt.s32.totalorder %s1760_s27, %s1760_s27 }
   0xe   :  { %1972 = vmatmul.mubr.msk.f32.gmra.mxu0 %vm158_vm0, %v23_v12  ;;  %1991 = vmatprep.subr.mxu1 %v2385_v19  ;;  %v157_v26 = vrot.slane %v2409_v25, %v156_v24  ;;  %v588_v12 = vld [vmem:[%s3239_s2 + $0x48] sm:$0xff]  ;;  %p2252_p0 = scmp.ne.s32.totalorder %s1760_s27, %s2251_s28  ;;  %p2257_p2 = scmp.lt.s32.totalorder %s2251_s28, %s2251_s28 }
   0xf   :  { %1974 = vmatprep.mubr.msk.f32.mxu0 %vm158_vm0, %v24_v13  ;;  %1992 = vmatpush3.msra.mxu1 %v2385_v19  ;;  %v587_v13 = vld [vmem:[%s3239_s2 + $0x40] sm:$0xff] }
  0x10   :  { %1984 = vmatmul.mubr.msk.f32.gmra.mxu1 %vm158_vm0, %v31_v14  ;;  %1993 = vmatprep.subr.mxu1 %v2392_v20  ;;  %v586_v14 = vld [vmem:[%s3239_s2 + $0x38] sm:$0xff]  ;;  %p2258_p3 = por %p2257_p2, %p2256_p1 }
  0x11   :  { %1986 = vmatprep.mubr.msk.f32.mxu1 %vm158_vm0, %v32_v15  ;;  %1994 = vmatpush3.msra.mxu1 %v2392_v20  ;;  %v871_v15 = vld [vmem:[%s3239_s2 + $0x10] sm:$0xff] }
  0x12   :  { %1975 = vmatmul.mubr.msk.f32.gmra.mxu0 %vm158_vm0, %v25_v16  ;;  %1995 = vmatprep.subr.mxu1 %v2399_v21  ;;  %v374_v16 = vsub.s32 1, %v2403_v23  ;;  %p2259_p4 = pnand %p2258_p3, %p2252_p0 }
  0x13   :  { %1996 = vmatpush3.msra.mxu1 %v2399_v21  ;;  %2021 = vmatprep.subr.mxu0 %v589_v11 }
  0x14   :  { %1987 = vmatmul.mubr.msk.f32.gmra.mxu1 %vm158_vm0, %v33_v17  ;;  %2022 = vmatpush3.msra.mxu0 %v589_v11  ;;  %v2494_v17 = vrot.slane %v2409_v25, %v374_v16 }
  0x15   :  { %2023 = vmatprep.subr.mxu0 %v588_v12  ;;  %2053 = vmatprep.subr.mxu1 %v871_v15 }
  0x16   :  { %2024 = vmatpush3.msra.mxu0 %v588_v12 }
  0x17   :  { %2025 = vmatprep.subr.mxu0 %v587_v13 }
  0x18   :  { %2026 = vmatpush3.msra.mxu0 %v587_v13 }
  0x19   :  { %2027 = vmatprep.subr.mxu0 %v586_v14 }
  0x1a   :  { %2028 = vmatpush3.msra.mxu0 %v586_v14 }
  0x1b   :  { %2079 = vmatprep.subr.mxu0 %v2378_v18 }
  0xc6   :  { %v1967_v27 = vpop.f32.mrf.mxu0 }
  0xc7   :  { %v2412_v28 = vadd.f32 %v1967_v27, %v157_v26 }
  0xc8   :  { %v273_v29 = vpop.f32.mrf.mxu0  ;;  %v1979_v30 = vpop.f32.mrf.mxu1 }
  0xc9   :  { %v2414_v31 = vadd.f32 %v273_v29, %v157_v26  ;;  %v2438_v50 = vadd.f32 %v1979_v30, %v157_v26 }
  0xca   :  { %v1970_v32 = vpop.f32.mrf.mxu0  ;;  %v313_v33 = vpop.f32.mrf.mxu1 }
  0xcb   :  { %2122 = vtanh.f32 %v2414_v31  ;;  %v2418_v34 = vadd.f32 %v1970_v32, %v157_v26  ;;  %v2428_v44 = vadd.f32 %v313_v33, %v157_v26 }
  0xcc   :  { %2124 = vtanh.f32 %v2412_v28  ;;  %v283_v35 = vpop.f32.mrf.mxu0  ;;  %v1982_v36 = vpop.f32.mrf.mxu1 }
  0xcd   :  { %v2420_v37 = vadd.f32 %v283_v35, %v157_v26  ;;  %v2445_v55 = vadd.f32 %v1982_v36, %v157_v26 }
  0xce   :  { %v1973_v38 = vpop.f32.mrf.mxu0  ;;  %v323_v39 = vpop.f32.mrf.mxu1 }
  0xcf   :  { %2126 = vtanh.f32 %v2420_v37  ;;  %v2423_v40 = vadd.f32 %v1973_v38, %v157_v26  ;;  %v2441_v51 = vadd.f32 %v323_v39, %v157_v26 }
  0xd0   :  { %2128 = vtanh.f32 %v2418_v34  ;;  %v293_v41 = vpop.f32.mrf.mxu0  ;;  %v1985_v42 = vpop.f32.mrf.mxu1 }
  0xd1   :  { %v2426_v43 = vadd.f32 %v293_v41, %v157_v26  ;;  %2130 = vtanh.f32 %v2423_v40  ;;  %v2453_v60 = vadd.f32 %v1985_v42, %v157_v26 }
  0xd2   :  { %v1976_v45 = vpop.f32.mrf.mxu0  ;;  %v333_v48 = vpop.f32.mrf.mxu1 }
  0xd3   :  { %2132 = vtanh.f32 %v2426_v43  ;;  %v2432_v46 = vadd.f32 %v1976_v45, %v157_v26  ;;  %v2449_v56 = vadd.f32 %v333_v48, %v157_v26 }
  0xd4   :  { %v303_v47 = vpop.f32.mrf.mxu0  ;;  %2134 = vtanh.f32 %v2428_v44  ;;  %v1988_v53 = vpop.f32.mrf.mxu1 }
  0xd5   :  { %v2434_v49 = vadd.f32 %v303_v47, %v157_v26  ;;  %2136 = vtanh.f32 %v2432_v46  ;;  %v2461_v1 = vadd.f32 %v1988_v53, %v157_v26 }
  0xd6   :  { %v343_v58 = vpop.f32.mrf.mxu1 }
  0xd7   :  { %2138 = vtanh.f32 %v2434_v49  ;;  %v2457_v62 = vadd.f32 %v343_v58, %v157_v26 }
  0xd8   :  { %v2123_v52 = vpop.eup %2122  ;;  %2140 = vtanh.f32 %v2438_v50 }
  0xd9   :  { %v2125_v54 = vpop.eup %2124  ;;  %1997 = vmatprep.mubr.msk.f32.mxu1 %vm376_vm1, %v2123_v52  ;;  %2142 = vtanh.f32 %v2441_v51 }
  0xda   :  { %1998 = vmatmul.mubr.msk.f32.vlgmr.msra.gmra.mxu1 %vm376_vm1, %v2125_v54  ;;  %2144 = vtanh.f32 %v2445_v55 }
  0xdb   :  { %2146 = vtanh.f32 %v2449_v56  ;;  %2054 = vmatpush3.msra.mxu1 %v871_v15 }
  0xdc   :  { %v2127_v57 = vpop.eup %2126  ;;  %2148 = vtanh.f32 %v2453_v60 }
  0xdd   :  { %v2129_v59 = vpop.eup %2128  ;;  %2000 = vmatprep.mubr.msk.f32.mxu1 %vm376_vm1, %v2127_v57  ;;  %2150 = vtanh.f32 %v2457_v62 }
  0xde   :  { %2001 = vmatmul.mubr.msk.f32.gmra.mxu1 %vm376_vm1, %v2129_v59  ;;  %v2131_v61 = vpop.eup %2130  ;;  %2152 = vtanh.f32 %v2461_v1 }
  0xe0   :  { %v2133_v63 = vpop.eup %2132 }
  0xe1   :  { %2003 = vmatprep.mubr.msk.f32.mxu1 %vm376_vm1, %v2133_v63  ;;  %v2135_v0 = vpop.eup %2134 }
  0xe2   :  { %2004 = vmatmul.mubr.msk.f32.gmra.mxu1 %vm376_vm1, %v2131_v61  ;;  %v2137_v2 = vpop.eup %2136 }
  0xe4   :  { %v2139_v3 = vpop.eup %2138 }
  0xe5   :  { %2006 = vmatprep.mubr.msk.f32.mxu1 %vm376_vm1, %v2139_v3  ;;  %v2141_v4 = vpop.eup %2140 }
  0xe6   :  { %2007 = vmatmul.mubr.msk.f32.gmra.mxu1 %vm376_vm1, %v2137_v2  ;;  %v2143_v5 = vpop.eup %2142 }
  0xe7   :  { %2009 = vmatprep.mubr.msk.f32.mxu1 %vm376_vm1, %v2135_v0  ;;  %v2145_v6 = vpop.eup %2144 }
  0xe8   :  { %v2147_v7 = vpop.eup %2146 }
  0xe9   :  { %v2149_v8 = vpop.eup %2148 }
  0xea   :  { %2010 = vmatmul.mubr.msk.f32.gmra.mxu1 %vm376_vm1, %v2141_v4  ;;  %v2151_v9 = vpop.eup %2150 }
  0xeb   :  { %2012 = vmatprep.mubr.msk.f32.mxu1 %vm376_vm1, %v2143_v5  ;;  %v2153_v10 = vpop.eup %2152 }
  0xee   :  { %2013 = vmatmul.mubr.msk.f32.gmra.mxu1 %vm376_vm1, %v2145_v6 }
  0xef   :  { %2015 = vmatprep.mubr.msk.f32.mxu1 %vm376_vm1, %v2147_v7 }
  0xf2   :  { %2016 = vmatmul.mubr.msk.f32.gmra.mxu1 %vm376_vm1, %v2149_v8 }
  0xf3   :  { %2018 = vmatprep.mubr.msk.f32.mxu1 %vm376_vm1, %v2151_v9 }
  0xf6   :  { %2019 = vmatmul.mubr.msk.f32.gmra.mxu1 %vm376_vm1, %v2153_v10 }
 0x19a   :  { %v1999_v22 = vpop.f32.mrf.mxu1 }
 0x19b   :  { %v497_v24 = vadd.f32 %v1999_v22, %v2494_v17 }
 0x19c   :  { %v491_v26 = vpop.f32.mrf.mxu1 }
 0x19d   :  { %v492_v27 = vadd.f32 %v491_v26, %v2494_v17 }
 0x19e   :  { %v2002_v29 = vpop.f32.mrf.mxu1 }
 0x19f   :  { %2154 = vtanh.f32 %v492_v27  ;;  %v507_v30 = vadd.f32 %v2002_v29, %v2494_v17  ;;  %v789_v27 = vsub.s32 3, %v2403_v23  ;;  %v592_v29 = vsub.s32 2, %v2403_v23 }
 0x1a0   :  { %2156 = vtanh.f32 %v497_v24  ;;  %v501_v32 = vpop.f32.mrf.mxu1 }
 0x1a1   :  { %v502_v33 = vadd.f32 %v501_v32, %v2494_v17  ;;  %v2543_v32 = vld [vmem:[%s3238_s1 + $0x8] sm:$0xff] }
 0x1a2   :  { %v2005_v35 = vpop.f32.mrf.mxu1 }
 0x1a3   :  { %2158 = vtanh.f32 %v502_v33  ;;  %v517_v36 = vadd.f32 %v2005_v35, %v2494_v17  ;;  %v2546_v33 = vrot.slane %v2409_v25, %v592_v29  ;;  %v2551_v35 = vld [vmem:[%s3238_s1] sm:$0xff] }
 0x1a4   :  { %2160 = vtanh.f32 %v507_v30  ;;  %v511_v38 = vpop.f32.mrf.mxu1  ;;  %v2538_v30 = vrot.slane %v2409_v25, %v789_v27 }
 0x1a5   :  { %v512_v39 = vadd.f32 %v511_v38, %v2494_v17 }
 0x1a6   :  { %v2008_v41 = vpop.f32.mrf.mxu1 }
 0x1a7   :  { %2162 = vtanh.f32 %v512_v39  ;;  %v527_v42 = vadd.f32 %v2008_v41, %v2494_v17  ;;  %v2558_v39 = vld [vmem:[%s3238_s1 + $0x18] sm:$0xff] }
 0x1a8   :  { %2164 = vtanh.f32 %v517_v36  ;;  %v521_v45 = vpop.f32.mrf.mxu1  ;;  %v792_v36 = vmul.f32 %v2538_v30, %v2543_v32 }
 0x1a9   :  { %v522_v47 = vadd.f32 %v521_v45, %v2494_v17 }
 0x1aa   :  { %v2011_v48 = vpop.f32.mrf.mxu1 }
 0x1ab   :  { %2166 = vtanh.f32 %v522_v47  ;;  %v537_v53 = vadd.f32 %v2011_v48, %v2494_v17  ;;  %v2566_v47 = vld [vmem:[%s3238_s1 + $0x10] sm:$0xff] }
 0x1ac   :  { %v2155_v52 = vpop.eup %2154  ;;  %2168 = vtanh.f32 %v527_v42  ;;  %v531_v54 = vpop.f32.mrf.mxu1  ;;  %v791_v42 = vmul.f32 %v2538_v30, %v2551_v35 }
 0x1ad   :  { %v2157_v57 = vpop.eup %2156  ;;  %v532_v58 = vadd.f32 %v531_v54, %v2494_v17  ;;  %2029 = vmatprep.mubr.msk.f32.mxu0 %vm376_vm1, %v2155_v52  ;;  %v2576_v54 = vld [vmem:[%s3238_s1 + $0x28] sm:$0xff] }
 0x1ae   :  { %v2014_v59 = vpop.f32.mrf.mxu1  ;;  %2030 = vmatmul.mubr.msk.f32.vlgmr.msra.gmra.mxu0 %vm376_vm1, %v2157_v57 }
 0x1af   :  { %2170 = vtanh.f32 %v532_v58  ;;  %2080 = vmatpush3.msra.mxu0 %v2378_v18  ;;  %v547_v63 = vadd.f32 %v2014_v59, %v2494_v17 }
 0x1b0   :  { %v2159_v61 = vpop.eup %2158  ;;  %2172 = vtanh.f32 %v537_v53  ;;  %v541_v0 = vpop.f32.mrf.mxu1  ;;  %2081 = vmatprep.subr.mxu0 %v2385_v19  ;;  %v794_v53 = vmul.f32 %v2538_v30, %v2558_v39 }
 0x1b1   :  { %v2161_v2 = vpop.eup %2160  ;;  %v542_v3 = vadd.f32 %v541_v0, %v2494_v17  ;;  %2032 = vmatprep.mubr.msk.f32.mxu0 %vm376_vm1, %v2159_v61  ;;  %2082 = vmatpush3.msra.mxu0 %v2385_v19  ;;  %v793_v61 = vmul.f32 %v2538_v30, %v2566_v47 }
 0x1b2   :  { %v2017_v4 = vpop.f32.mrf.mxu1  ;;  %2033 = vmatmul.mubr.msk.f32.gmra.mxu0 %vm376_vm1, %v2161_v2  ;;  %2083 = vmatprep.subr.mxu0 %v2392_v20  ;;  %v796_v2 = vmul.f32 %v2538_v30, %v2576_v54 }
 0x1b3   :  { %2174 = vtanh.f32 %v542_v3  ;;  %2084 = vmatpush3.msra.mxu0 %v2392_v20  ;;  %v557_v5 = vadd.f32 %v2017_v4, %v2494_v17  ;;  %v2591_v3 = vld [vmem:[%s3238_s1 + $0x20] sm:$0xff] }
 0x1b4   :  { %v2163_v18 = vpop.eup %2162  ;;  %2176 = vtanh.f32 %v547_v63  ;;  %v551_v6 = vpop.f32.mrf.mxu1  ;;  %2085 = vmatprep.subr.mxu0 %v2399_v21 }
 0x1b5   :  { %v2165_v7 = vpop.eup %2164  ;;  %v552_v8 = vadd.f32 %v551_v6, %v2494_v17  ;;  %2035 = vmatprep.mubr.msk.f32.mxu0 %vm376_vm1, %v2163_v18  ;;  %2086 = vmatpush3.msra.mxu0 %v2399_v21 }
 0x1b6   :  { %v2020_v19 = vpop.f32.mrf.mxu1  ;;  %2036 = vmatmul.mubr.msk.f32.gmra.mxu0 %vm376_vm1, %v2165_v7  ;;  %v2602_v7 = vld [vmem:[%s3238_s1 + $0x38] sm:$0xff] }
 0x1b7   :  { %2178 = vtanh.f32 %v552_v8  ;;  %v567_v20 = vadd.f32 %v2020_v19, %v2494_v17 }
 0x1b8   :  { %v2167_v9 = vpop.eup %2166  ;;  %2180 = vtanh.f32 %v557_v5  ;;  %v561_v10 = vpop.f32.mrf.mxu1 }
 0x1b9   :  { %v2169_v11 = vpop.eup %2168  ;;  %v562_v12 = vadd.f32 %v561_v10, %v2494_v17  ;;  %2038 = vmatprep.mubr.msk.f32.mxu0 %vm376_vm1, %v2167_v9  ;;  %v795_v9 = vmul.f32 %v2538_v30, %v2591_v3 }
 0x1ba   :  { %2039 = vmatmul.mubr.msk.f32.gmra.mxu0 %vm376_vm1, %v2169_v11 }
 0x1bb   :  { %2182 = vtanh.f32 %v562_v12 }
 0x1bc   :  { %v2171_v13 = vpop.eup %2170  ;;  %2184 = vtanh.f32 %v567_v20 }
 0x1bd   :  { %v2173_v21 = vpop.eup %2172  ;;  %2041 = vmatprep.mubr.msk.f32.mxu0 %vm376_vm1, %v2171_v13  ;;  %v2622_v13 = vld [vmem:[%s3238_s1 + $0x30] sm:$0xff] }
 0x1be   :  { %2042 = vmatmul.mubr.msk.f32.gmra.mxu0 %vm376_vm1, %v2173_v21  ;;  %v797_v29 = vmul.f32 %v2538_v30, %v2622_v13 }
 0x1c0   :  { %v2175_v14 = vpop.eup %2174 }
 0x1c1   :  { %v2177_v15 = vpop.eup %2176  ;;  %2044 = vmatprep.mubr.msk.f32.mxu0 %vm376_vm1, %v2175_v14 }
 0x1c2   :  { %2045 = vmatmul.mubr.msk.f32.gmra.mxu0 %vm376_vm1, %v2177_v15 }
 0x1c4   :  { %v2179_v16 = vpop.eup %2178 }
 0x1c5   :  { %v2181_v22 = vpop.eup %2180  ;;  %2047 = vmatprep.mubr.msk.f32.mxu0 %vm376_vm1, %v2179_v16  ;;  %v798_v16 = vmul.f32 %v2538_v30, %v2602_v7 }
 0x1c6   :  { %2048 = vmatmul.mubr.msk.f32.gmra.mxu0 %vm376_vm1, %v2181_v22 }
 0x1c8   :  { %v2183_v24 = vpop.eup %2182 }
 0x1c9   :  { %v2185_v26 = vpop.eup %2184  ;;  %2050 = vmatprep.mubr.msk.f32.mxu0 %vm376_vm1, %v2183_v24  ;;  %v2636_v24 = vld [vmem:[%s3238_s1 + $0x48] sm:$0xff] }
 0x1ca   :  { %2051 = vmatmul.mubr.msk.f32.gmra.mxu0 %vm376_vm1, %v2185_v26 }
 0x26e   :  { %v2031_v38 = vpop.f32.mrf.mxu0 }
 0x26f   :  { %v714_v41 = vadd.f32 %v2031_v38, %v2546_v33 }
 0x270   :  { %v708_v45 = vpop.f32.mrf.mxu0 }
 0x271   :  { %v2568_v48 = vadd.f32 %v792_v36, %v714_v41  ;;  %v709_v52 = vadd.f32 %v708_v45, %v2546_v33  ;;  %v2656_v45 = vld [vmem:[%s3238_s1 + $0x40] sm:$0xff] }
 0x272   :  { %v2034_v57 = vpop.f32.mrf.mxu0 }
 0x273   :  { %1496 = vst.msk [vmem:[#allocation2 + $0x8] sm:$0xff] %vm67_vm2, %v2568_v48  ;;  %v2580_v58 = vadd.f32 %v791_v42, %v709_v52  ;;  %v724_v59 = vadd.f32 %v2034_v57, %v2546_v33  ;;  %v3257_v63 = vclamps-f32 %v2568_v48, 1.0 }
 0x274   :  { %v718_v0 = vpop.f32.mrf.mxu0 }
 0x275   :  { %v3250_v4 = vclamps-f32 %v2580_v58, 1.0  ;;  %1495 = vst.msk [vmem:[#allocation2] sm:$0xff] %vm67_vm2, %v2580_v58  ;;  %v2596_v18 = vadd.f32 %v794_v53, %v724_v59  ;;  %v719_v5 = vadd.f32 %v718_v0, %v2546_v33  ;;  %v856_v10 = vsel %vm67_vm2, %v3257_v63, 0.0  ;;  %v2670_v0 = vld [vmem:[%s3238_s1 + $0x58] sm:$0xff] }
 0x276   :  { %v2037_v6 = vpop.f32.mrf.mxu0  ;;  %v800_v59 = vmul.f32 %v2538_v30, %v2636_v24 }
 0x277   :  { %1498 = vst.msk [vmem:[#allocation2 + $0x18] sm:$0xff] %vm67_vm2, %v2596_v18  ;;  %v2606_v8 = vadd.f32 %v793_v61, %v719_v5  ;;  %v734_v19 = vadd.f32 %v2037_v6, %v2546_v33  ;;  %v855_v20 = vsel %vm67_vm2, %v3250_v4, 0.0  ;;  %v3248_v11 = vclamps-f32 %v2596_v18, 1.0 }
 0x278   :  { %v728_v12 = vpop.f32.mrf.mxu0  ;;  %2055 = vmatprep.mubr.msk.f32.mxu1 %vm872_vm3, %v855_v20  ;;  %v799_v6 = vmul.f32 %v2538_v30, %v2656_v45 }
 0x279   :  { %v3249_v21 = vclamps-f32 %v2606_v8, 1.0  ;;  %1497 = vst.msk [vmem:[#allocation2 + $0x10] sm:$0xff] %vm67_vm2, %v2606_v8  ;;  %v2627_v14 = vadd.f32 %v796_v2, %v734_v19  ;;  %v729_v15 = vadd.f32 %v728_v12, %v2546_v33  ;;  %2056 = vmatmul.mubr.msk.f32.vlgmr.msra.gmra.mxu1 %vm872_vm3, %v856_v10  ;;  %v858_v42 = vsel %vm67_vm2, %v3248_v11, 0.0  ;;  %v2690_v12 = vld [vmem:[%s3238_s1 + $0x50] sm:$0xff] }
 0x27a   :  { %v2040_v22 = vpop.f32.mrf.mxu0 }
 0x27b   :  { %1500 = vst.msk [vmem:[#allocation2 + $0x28] sm:$0xff] %vm67_vm2, %v2627_v14  ;;  %v2640_v26 = vadd.f32 %v795_v9, %v729_v15  ;;  %v744_v27 = vadd.f32 %v2040_v22, %v2546_v33  ;;  %v857_v36 = vsel %vm67_vm2, %v3249_v21, 0.0  ;;  %v3244_v38 = vclamps-f32 %v2627_v14, 1.0 }
 0x27c   :  { %v738_v41 = vpop.f32.mrf.mxu0  ;;  %2058 = vmatprep.mubr.msk.f32.mxu1 %vm872_vm3, %v857_v36  ;;  %v2704_v36 = vld [vmem:[%s3238_s1 + $0x68] sm:$0xff] }
 0x27d   :  { %v3245_v52 = vclamps-f32 %v2640_v26, 1.0  ;;  %1499 = vst.msk [vmem:[#allocation2 + $0x20] sm:$0xff] %vm67_vm2, %v2640_v26  ;;  %v2661_v53 = vadd.f32 %v798_v16, %v744_v27  ;;  %v739_v57 = vadd.f32 %v738_v41, %v2546_v33  ;;  %2059 = vmatmul.mubr.msk.f32.gmra.mxu1 %vm872_vm3, %v858_v42  ;;  %v860_v10 = vsel %vm67_vm2, %v3244_v38, 0.0 }
 0x27e   :  { %v2043_v61 = vpop.f32.mrf.mxu0  ;;  %v802_v27 = vmul.f32 %v2538_v30, %v2670_v0 }
 0x27f   :  { %1502 = vst.msk [vmem:[#allocation2 + $0x38] sm:$0xff] %vm67_vm2, %v2661_v53  ;;  %v2674_v2 = vadd.f32 %v797_v29, %v739_v57  ;;  %v754_v5 = vadd.f32 %v2043_v61, %v2546_v33  ;;  %v859_v19 = vsel %vm67_vm2, %v3245_v52, 0.0  ;;  %v3242_v9 = vclamps-f32 %v2661_v53, 1.0 }
 0x280   :  { %v748_v20 = vpop.f32.mrf.mxu0  ;;  %2061 = vmatprep.mubr.msk.f32.mxu1 %vm872_vm3, %v859_v19  ;;  %v801_v57 = vmul.f32 %v2538_v30, %v2690_v12 }
 0x281   :  { %v3243_v15 = vclamps-f32 %v2674_v2, 1.0  ;;  %1501 = vst.msk [vmem:[#allocation2 + $0x30] sm:$0xff] %vm67_vm2, %v2674_v2  ;;  %v2695_v16 = vadd.f32 %v800_v59, %v754_v5  ;;  %v749_v22 = vadd.f32 %v748_v20, %v2546_v33  ;;  %2062 = vmatmul.mubr.msk.f32.gmra.mxu1 %vm872_vm3, %v860_v10  ;;  %v862_v19 = vsel %vm67_vm2, %v3242_v9, 0.0  ;;  %v2738_v9 = vld [vmem:[%s3238_s1 + $0x78] sm:$0xff] }
 0x282   :  { %v2046_v29 = vpop.f32.mrf.mxu0 }
 0x283   :  { %1504 = vst.msk [vmem:[#allocation2 + $0x48] sm:$0xff] %vm67_vm2, %v2695_v16  ;;  %v2708_v41 = vadd.f32 %v799_v6, %v749_v22  ;;  %v764_v42 = vadd.f32 %v2046_v29, %v2546_v33  ;;  %v861_v59 = vsel %vm67_vm2, %v3243_v15, 0.0  ;;  %v3247_v61 = vclamps-f32 %v2695_v16, 1.0  ;;  %v2724_v6 = vld [vmem:[%s3238_s1 + $0x60] sm:$0xff] }
 0x284   :  { %v758_v5 = vpop.f32.mrf.mxu0  ;;  %2064 = vmatprep.mubr.msk.f32.mxu1 %vm872_vm3, %v861_v59  ;;  %v804_v29 = vmul.f32 %v2538_v30, %v2704_v36 }
 0x285   :  { %v3246_v20 = vclamps-f32 %v2708_v41, 1.0  ;;  %1503 = vst.msk [vmem:[#allocation2 + $0x40] sm:$0xff] %vm67_vm2, %v2708_v41  ;;  %v2729_v10 = vadd.f32 %v802_v27, %v764_v42  ;;  %v759_v22 = vadd.f32 %v758_v5, %v2546_v33  ;;  %2065 = vmatmul.mubr.msk.f32.gmra.mxu1 %vm872_vm3, %v862_v19  ;;  %v803_v42 = vmul.f32 %v2538_v30, %v2724_v6 }
 0x286   :  { %v2049_v59 = vpop.f32.mrf.mxu0  ;;  %v864_v52 = vsel %vm67_vm2, %v3247_v61, 0.0 }
 0x287   :  { %1506 = vst.msk [vmem:[#allocation2 + $0x58] sm:$0xff] %vm67_vm2, %v2729_v10  ;;  %v2742_v15 = vadd.f32 %v801_v57, %v759_v22  ;;  %v774_v27 = vadd.f32 %v2049_v59, %v2546_v33  ;;  %v863_v5 = vsel %vm67_vm2, %v3246_v20, 0.0  ;;  %v3251_v19 = vclamps-f32 %v2729_v10, 1.0  ;;  %v2758_v57 = vld [vmem:[%s3238_s1 + $0x70] sm:$0xff]  ;;  %s2273_s1 = smov 96  }
 0x288   :  { %v768_v38 = vpop.f32.mrf.mxu0  ;;  %2067 = vmatprep.mubr.msk.f32.mxu1 %vm872_vm3, %v863_v5  ;;  %v806_v5 = vmul.f32 %v2538_v30, %v2738_v9  ;;  %v805_v4 = vmul.f32 %v2538_v30, %v2758_v57 }
 0x289   :  { %v3255_v22 = vclamps-f32 %v2742_v15, 1.0  ;;  %1505 = vst.msk [vmem:[#allocation2 + $0x50] sm:$0xff] %vm67_vm2, %v2742_v15  ;;  %v2763_v59 = vadd.f32 %v804_v29, %v774_v27  ;;  %v769_v20 = vadd.f32 %v768_v38, %v2546_v33  ;;  %2068 = vmatmul.mubr.msk.f32.gmra.mxu1 %vm872_vm3, %v864_v52  ;;  %v866_v27 = vsel %vm67_vm2, %v3251_v19, 0.0 }
 0x28a   :  { %v2052_v61 = vpop.f32.mrf.mxu0 }
 0x28b   :  { %1508 = vst.msk [vmem:[#allocation2 + $0x68] sm:$0xff] %vm67_vm2, %v2763_v59  ;;  %v2771_v11 = vadd.f32 %v803_v42, %v769_v20  ;;  %v784_v21 = vadd.f32 %v2052_v61, %v2546_v33  ;;  %v865_v38 = vsel %vm67_vm2, %v3255_v22, 0.0  ;;  %v3252_v52 = vclamps-f32 %v2763_v59, 1.0 }
 0x28c   :  { %v778_v29 = vpop.f32.mrf.mxu0  ;;  %2070 = vmatprep.mubr.msk.f32.mxu1 %vm872_vm3, %v865_v38 }
 0x28d   :  { %v3253_v20 = vclamps-f32 %v2771_v11, 1.0  ;;  %1507 = vst.msk [vmem:[#allocation2 + $0x60] sm:$0xff] %vm67_vm2, %v2771_v11  ;;  %v2787_v61 = vadd.f32 %v806_v5, %v784_v21  ;;  %v779_v30 = vadd.f32 %v778_v29, %v2546_v33  ;;  %2071 = vmatmul.mubr.msk.f32.gmra.mxu1 %vm872_vm3, %v866_v27  ;;  %v868_v21 = vsel %vm67_vm2, %v3252_v52, 0.0 }
 0x28f   :  { %1510 = vst.msk [vmem:[#allocation2 + $0x78] sm:$0xff] %vm67_vm2, %v2787_v61  ;;  %v2793_v42 = vadd.f32 %v805_v4, %v779_v30  ;;  %v867_v38 = vsel %vm67_vm2, %v3253_v20, 0.0  ;;  %v3256_v19 = vclamps-f32 %v2787_v61, 1.0 }
 0x290   :  { %2073 = vmatprep.mubr.msk.f32.mxu1 %vm872_vm3, %v867_v38 }
 0x291   :  { %v3254_v33 = vclamps-f32 %v2793_v42, 1.0  ;;  %1509 = vst.msk [vmem:[#allocation2 + $0x70] sm:$0xff] %vm67_vm2, %v2793_v42  ;;  %2074 = vmatmul.mubr.msk.f32.gmra.mxu1 %vm872_vm3, %v868_v21  ;;  %v870_v5 = vsel %vm67_vm2, %v3256_v19, 0.0 }
 0x293   :  { %v869_v4 = vsel %vm67_vm2, %v3254_v33, 0.0 }
 0x294   :  { %2076 = vmatprep.mubr.msk.f32.mxu1 %vm872_vm3, %v869_v4 }
 0x295   :  { %2077 = vmatmul.mubr.msk.f32.gmra.mxu1 %vm872_vm3, %v870_v5 }
 0x339   :  { %v2057_v29 = vpop.f32.mrf.mxu1 }
 0x33a   :  { %v1067_v38 = vadd.f32 %v2057_v29, %v2412_v28 }
 0x33b   :  { %v987_v27 = vpop.f32.mrf.mxu1 }
 0x33c   :  { %v1066_v30 = vadd.f32 %v987_v27, %v2414_v31 }
 0x33d   :  { %v2060_v52 = vpop.f32.mrf.mxu1 }
 0x33e   :  { %2186 = vtanh.f32 %v1066_v30  ;;  %v1069_v4 = vadd.f32 %v2060_v52, %v2418_v34 }
 0x33f   :  { %v997_v21 = vpop.f32.mrf.mxu1  ;;  %2188 = vtanh.f32 %v1067_v38 }
 0x340   :  { %v1068_v20 = vadd.f32 %v997_v21, %v2420_v37 }
 0x341   :  { %v2063_v33 = vpop.f32.mrf.mxu1 }
 0x342   :  { %2190 = vtanh.f32 %v1068_v20  ;;  %v1071_v5 = vadd.f32 %v2063_v33, %v2423_v40 }
 0x343   :  { %v1007_v22 = vpop.f32.mrf.mxu1  ;;  %2192 = vtanh.f32 %v1069_v4 }
 0x344   :  { %v1070_v19 = vadd.f32 %v1007_v22, %v2426_v43 }
 0x345   :  { %v2066_v63 = vpop.f32.mrf.mxu1 }
 0x346   :  { %2194 = vtanh.f32 %v1070_v19  ;;  %v1073_v29 = vadd.f32 %v2066_v63, %v2432_v46 }
 0x347   :  { %v1017_v31 = vpop.f32.mrf.mxu1  ;;  %2196 = vtanh.f32 %v1071_v5 }
 0x348   :  { %v1072_v28 = vadd.f32 %v1017_v31, %v2434_v49 }
 0x349   :  { %v2069_v37 = vpop.f32.mrf.mxu1 }
 0x34a   :  { %2198 = vtanh.f32 %v1072_v28  ;;  %v1075_v40 = vadd.f32 %v2069_v37, %v2438_v50 }
 0x34b   :  { %v2187_v27 = vpop.eup %2186  ;;  %v1027_v34 = vpop.f32.mrf.mxu1  ;;  %2200 = vtanh.f32 %v1073_v29 }
 0x34c   :  { %v1074_v52 = vadd.f32 %v1027_v34, %v2428_v44  ;;  %1114 = vrot.lane.b32.xlu0 %v2187_v27, %s2273_s1  ;;  %v2189_v19 = vpop.eup %2188 }
 0x34d   :  { %v2072_v43 = vpop.f32.mrf.mxu1 }
 0x34e   :  { %2202 = vtanh.f32 %v1074_v52  ;;  %v1077_v44 = vadd.f32 %v2072_v43, %v2445_v55  ;;  %v52_v43 = vmul.f32 %v2543_v32, %v2543_v32 }
 0x34f   :  { %v2191_v22 = vpop.eup %2190  ;;  %v1037_v49 = vpop.f32.mrf.mxu1  ;;  %2204 = vtanh.f32 %v1075_v40 }
 0x350   :  { %v1076_v20 = vadd.f32 %v1037_v49, %v2441_v51  ;;  %1116 = vrot.lane.b32.xlu0 %v2189_v19, %s2273_s1  ;;  %1118 = vrot.lane.b32.xlu1 %v2191_v22, %s2273_s1  ;;  %v2193_v63 = vpop.eup %2192  ;;  %v71_v19 = vsel %vm67_vm2, %v52_v43, 0.0  ;;  %v53_v22 = vmul.f32 %v2566_v47, %v2566_v47  ;;  %v51_v49 = vmul.f32 %v2551_v35, %v2551_v35 }
 0x351   :  { %v2075_v46 = vpop.f32.mrf.mxu1  ;;  %v57_v47 = vmul.f32 %v2622_v13, %v2622_v13  ;;  %v3271_v43 = vclamps-f32 %v2763_v59, 1.0 }
 0x352   :  { %2206 = vtanh.f32 %v1076_v20  ;;  %v1079_v51 = vadd.f32 %v2075_v46, %v2453_v60  ;;  %v74_v20 = vsel %vm67_vm2, %v53_v22, 0.0  ;;  %v54_v46 = vmul.f32 %v2558_v39, %v2558_v39 }
 0x353   :  { %v2195_v33 = vpop.eup %2194  ;;  %v1047_v30 = vpop.f32.mrf.mxu1  ;;  %2208 = vtanh.f32 %v1077_v44  ;;  %v68_v44 = vsel %vm67_vm2, %v51_v49, 0.0  ;;  %v3273_v22 = vclamps-f32 %v2787_v61, 1.0 }
 0x354   :  { %v1078_v50 = vadd.f32 %v1047_v30, %v2449_v56  ;;  %1120 = vrot.lane.b32.xlu1 %v2193_v63, %s2273_s1  ;;  %1122 = vrot.lane.b32.xlu0 %v2195_v33, %s2273_s1  ;;  %v2197_v21 = vpop.eup %2196  ;;  %v77_v35 = vsel %vm67_vm2, %v54_v46, 0.0  ;;  %v56_v63 = vmul.f32 %v2576_v54, %v2576_v54  ;;  %v59_v33 = vmul.f32 %v2656_v45, %v2656_v45 }
 0x355   :  { %v2078_v38 = vpop.f32.mrf.mxu1  ;;  %v58_v30 = vmul.f32 %v2602_v7, %v2602_v7 }
 0x356   :  { %2210 = vtanh.f32 %v1078_v50  ;;  %v1081_v31 = vadd.f32 %v2078_v38, %v2461_v1  ;;  %v1341_v1 = vsub.s32 4, %v2403_v23  ;;  %v83_v39 = vsel %vm67_vm2, %v56_v63, 0.0 }
 0x357   :  { %v2199_v4 = vpop.eup %2198  ;;  %v1057_v5 = vpop.f32.mrf.mxu1  ;;  %2212 = vtanh.f32 %v1079_v51  ;;  %v92_v13 = vsel %vm67_vm2, %v59_v33, 0.0  ;;  %v62_v50 = vmul.f32 %v2670_v0, %v2670_v0  ;;  %v89_v54 = vsel %vm67_vm2, %v58_v30, 0.0 }
 0x358   :  { %v1080_v55 = vadd.f32 %v1057_v5, %v2457_v62  ;;  %1124 = vrot.lane.b32.xlu1 %v2197_v21, %s2273_s1  ;;  %1126 = vrot.lane.b32.xlu0 %v2199_v4, %s2273_s1  ;;  %v2201_v56 = vpop.eup %2200  ;;  %v1342_v52 = vrot.slane %v2409_v25, %v1341_v1  ;;  %v55_v25 = vmul.f32 %v2591_v3, %v2591_v3  ;;  %v86_v3 = vsel %vm67_vm2, %v57_v47, 0.0 }
 0x359   :  { %v60_v51 = vmul.f32 %v2636_v24, %v2636_v24  ;;  %v101_v45 = vsel %vm67_vm2, %v62_v50, 0.0  ;;  %v63_v38 = vmul.f32 %v2724_v6, %v2724_v6  ;;  %v61_v21 = vmul.f32 %v2690_v12, %v2690_v12 }
 0x35a   :  { %2214 = vtanh.f32 %v1080_v55  ;;  %v80_v32 = vsel %vm67_vm2, %v55_v25, 0.0  ;;  %v65_v4 = vmul.f32 %v2758_v57, %v2758_v57  ;;  %v64_v5 = vmul.f32 %v2704_v36, %v2704_v36 }
 0x35b   :  { %v2203_v28 = vpop.eup %2202  ;;  %2216 = vtanh.f32 %v1081_v31  ;;  %v95_v7 = vsel %vm67_vm2, %v60_v51, 0.0  ;;  %v104_v0 = vsel %vm67_vm2, %v63_v38, 0.0  ;;  %v98_v24 = vsel %vm67_vm2, %v61_v21, 0.0 }
 0x35c   :  { %1128 = vrot.lane.b32.xlu1 %v2201_v56, %s2273_s1  ;;  %1130 = vrot.lane.b32.xlu0 %v2203_v28, %s2273_s1  ;;  %v2205_v60 = vpop.eup %2204  ;;  %v110_v6 = vsel %vm67_vm2, %v65_v4, 0.0  ;;  %v107_v55 = vsel %vm67_vm2, %v64_v5, 0.0  ;;  %v66_v12 = vmul.f32 %v2738_v9, %v2738_v9  ;;  %v3258_v57 = vclamps-f32 %v2568_v48, 1.0 }
 0x35d   :  { %v3259_v36 = vclamps-f32 %v2580_v58, 1.0  ;;  %v3260_v9 = vclamps-f32 %v2606_v8, 1.0  ;;  %v3261_v28 = vclamps-f32 %v2596_v18, 1.0  ;;  %v3262_v48 = vclamps-f32 %v2640_v26, 1.0 }
 0x35e   :  { %v113_v56 = vsel %vm67_vm2, %v66_v12, 0.0  ;;  %v3263_v58 = vclamps-f32 %v2627_v14, 1.0  ;;  %v3264_v18 = vclamps-f32 %v2674_v2, 1.0  ;;  %v3266_v14 = vclamps-f32 %v2708_v41, 1.0 }
 0x35f   :  { %v2207_v29 = vpop.eup %2206  ;;  %v134_v25 = vsub.s32 6, %v2403_v23 }
 0x360   :  { %1132 = vrot.lane.b32.xlu1 %v2205_v60, %s2273_s1  ;;  %1134 = vrot.lane.b32.xlu0 %v2207_v29, %s2273_s1  ;;  %v2209_v62 = vpop.eup %2208 }
 0x363   :  { %v2211_v37 = vpop.eup %2210 }
 0x364   :  { %1136 = vrot.lane.b32.xlu1 %v2209_v62, %s2273_s1  ;;  %1138 = vrot.lane.b32.xlu0 %v2211_v37, %s2273_s1  ;;  %v2213_v27 = vpop.eup %2212  ;;  %v3265_v37 = vclamps-f32 %v2661_v53, 1.0  ;;  %v3268_v53 = vclamps-f32 %v2742_v15, 1.0 }
 0x367   :  { %v2215_v34 = vpop.eup %2214 }
 0x368   :  { %1140 = vrot.lane.b32.xlu1 %v2213_v27, %s2273_s1  ;;  %1142 = vrot.lane.b32.xlu0 %v2215_v34, %s2273_s1  ;;  %v2217_v40 = vpop.eup %2216  ;;  %v3267_v27 = vclamps-f32 %v2695_v16, 1.0  ;;  %v3270_v16 = vclamps-f32 %v2771_v11, 1.0 }
 0x36c   :  { %1144 = vrot.lane.b32.xlu1 %v2217_v40, %s2273_s1  ;;  %1344 = vrot.lane.b32.xlu0 %v1342_v52, %s2274_s21  ;;  %v3269_v52 = vclamps-f32 %v2729_v10, 1.0  ;;  %v3272_v10 = vclamps-f32 %v2793_v42, 1.0  ;;  %v2967_v42 = vld [vmem:[%s3240_s3] sm:$0xff]  ;;  %s2277_s3 = smov 8  }
 0x36d   :  { %v2970_v61 = vrot.slane %v2967_v42, %v134_v25 }
 0x38b   :  { %72 = vadd.xlane.f32.xlu0 %v71_v19 }
 0x38f   :  { %75 = vadd.xlane.f32.xlu0 %v74_v20 }
 0x390   :  { %69 = vadd.xlane.f32.xlu1 %v68_v44 }
 0x393   :  { %81 = vadd.xlane.f32.xlu0 %v80_v32 }
 0x394   :  { %78 = vadd.xlane.f32.xlu1 %v77_v35 }
 0x397   :  { %87 = vadd.xlane.f32.xlu0 %v86_v3 }
 0x398   :  { %84 = vadd.xlane.f32.xlu1 %v83_v39 }
 0x39b   :  { %93 = vadd.xlane.f32.xlu0 %v92_v13 }
 0x39c   :  { %90 = vadd.xlane.f32.xlu1 %v89_v54 }
 0x39f   :  { %102 = vadd.xlane.f32.xlu0 %v101_v45 }
 0x3a0   :  { %96 = vadd.xlane.f32.xlu1 %v95_v7 }
 0x3a3   :  { %105 = vadd.xlane.f32.xlu0 %v104_v0 }
 0x3a4   :  { %99 = vadd.xlane.f32.xlu1 %v98_v24 }
 0x3a7   :  { %111 = vadd.xlane.f32.xlu0 %v110_v6 }
 0x3a8   :  { %108 = vadd.xlane.f32.xlu1 %v107_v55 }
 0x3ac   :  { %114 = vadd.xlane.f32.xlu1 %v113_v56 }
 0x3bd   :  { %1529 = vrot.lane.b32.xlu1 %v3258_v57, %s2275_s22  ;;  %1527 = vrot.lane.b32.xlu0 %v3259_v36, %s2275_s22 }
 0x3be   :  { %v1115_v31 = vpop.permute.xlu0 %1114 }
 0x3bf   :  { %2087 = vmatprep.mubr.msk.f32.mxu0 %vm376_vm1, %v1115_v31 }
 0x3c1   :  { %1531 = vrot.lane.b32.xlu1 %v3260_v9, %s2275_s22  ;;  %1533 = vrot.lane.b32.xlu0 %v3261_v28, %s2275_s22 }
 0x3c2   :  { %v1117_v60 = vpop.permute.xlu0 %1116  ;;  %v1119_v29 = vpop.permute.xlu1 %1118 }
 0x3c3   :  { %2088 = vmatmul.mubr.msk.f32.vlgmr.msra.gmra.mxu0 %vm376_vm1, %v1117_v60 }
 0x3c4   :  { %2090 = vmatprep.mubr.msk.f32.mxu0 %vm376_vm1, %v1119_v29 }
 0x3c5   :  { %1535 = vrot.lane.b32.xlu1 %v3262_v48, %s2275_s22  ;;  %1537 = vrot.lane.b32.xlu0 %v3263_v58, %s2275_s22 }
 0x3c6   :  { %v1121_v8 = vpop.permute.xlu1 %1120  ;;  %v1123_v62 = vpop.permute.xlu0 %1122 }
 0x3c7   :  { %2091 = vmatmul.mubr.msk.f32.gmra.mxu0 %vm376_vm1, %v1121_v8 }
 0x3c8   :  { %2093 = vmatprep.mubr.msk.f32.mxu0 %vm376_vm1, %v1123_v62 }
 0x3c9   :  { %1539 = vrot.lane.b32.xlu1 %v3264_v18, %s2275_s22  ;;  %1541 = vrot.lane.b32.xlu0 %v3265_v37, %s2275_s22 }
 0x3ca   :  { %v1125_v26 = vpop.permute.xlu1 %1124  ;;  %v1127_v1 = vpop.permute.xlu0 %1126 }
 0x3cb   :  { %2094 = vmatmul.mubr.msk.f32.gmra.mxu0 %vm376_vm1, %v1125_v26 }
 0x3cc   :  { %2096 = vmatprep.mubr.msk.f32.mxu0 %vm376_vm1, %v1127_v1 }
 0x3cd   :  { %1543 = vrot.lane.b32.xlu1 %v3266_v14, %s2275_s22  ;;  %1545 = vrot.lane.b32.xlu0 %v3267_v27, %s2275_s22 }
 0x3ce   :  { %v1129_v2 = vpop.permute.xlu1 %1128  ;;  %v1131_v34 = vpop.permute.xlu0 %1130 }
 0x3cf   :  { %2097 = vmatmul.mubr.msk.f32.gmra.mxu0 %vm376_vm1, %v1129_v2 }
 0x3d0   :  { %2099 = vmatprep.mubr.msk.f32.mxu0 %vm376_vm1, %v1131_v34 }
 0x3d1   :  { %1547 = vrot.lane.b32.xlu1 %v3268_v53, %s2275_s22  ;;  %1549 = vrot.lane.b32.xlu0 %v3269_v52, %s2275_s22 }
 0x3d2   :  { %v1133_v41 = vpop.permute.xlu1 %1132  ;;  %v1135_v40 = vpop.permute.xlu0 %1134 }
 0x3d3   :  { %2100 = vmatmul.mubr.msk.f32.gmra.mxu0 %vm376_vm1, %v1133_v41 }
 0x3d4   :  { %2102 = vmatprep.mubr.msk.f32.mxu0 %vm376_vm1, %v1135_v40 }
 0x3d5   :  { %1551 = vrot.lane.b32.xlu1 %v3270_v16, %s2275_s22  ;;  %1553 = vrot.lane.b32.xlu0 %v3271_v43, %s2275_s22 }
 0x3d6   :  { %v1137_v15 = vpop.permute.xlu1 %1136  ;;  %v1139_v19 = vpop.permute.xlu0 %1138 }
 0x3d7   :  { %2103 = vmatmul.mubr.msk.f32.gmra.mxu0 %vm376_vm1, %v1137_v15 }
 0x3d8   :  { %2105 = vmatprep.mubr.msk.f32.mxu0 %vm376_vm1, %v1139_v19 }
 0x3d9   :  { %1555 = vrot.lane.b32.xlu1 %v3272_v10, %s2275_s22  ;;  %1557 = vrot.lane.b32.xlu0 %v3273_v22, %s2275_s22 }
 0x3da   :  { %v1141_v11 = vpop.permute.xlu1 %1140  ;;  %v1143_v49 = vpop.permute.xlu0 %1142 }
 0x3db   :  { %2106 = vmatmul.mubr.msk.f32.gmra.mxu0 %vm376_vm1, %v1141_v11 }
 0x3dc   :  { %2108 = vmatprep.mubr.msk.f32.mxu0 %vm376_vm1, %v1143_v49 }
 0x3de   :  { %v1145_v59 = vpop.permute.xlu1 %1144  ;;  %v2961_v20 = vpop.permute.xlu0 %1344 }
 0x3df   :  { %2109 = vmatmul.mubr.msk.f32.gmra.mxu0 %vm376_vm1, %v1145_v59 }
 0x414   :  { %v73_v44 = vpop.xlane.xlu0 %72 }
 0x415   :  { %v117_v46 = vmul.f32 0.5, %v73_v44 }
 0x417   :  { %v137_v32 = vsub.f32 %v2970_v61, %v117_v46 }
 0x418   :  { %v76_v47 = vpop.xlane.xlu0 %75 }
 0x419   :  { %v70_v35 = vpop.xlane.xlu1 %69  ;;  %1691 = vrot.lane.b32.xlu0 %v137_v32, %s2276_s25  ;;  %v118_v63 = vmul.f32 0.5, %v76_v47 }
 0x41a   :  { %v116_v3 = vmul.f32 0.5, %v70_v35 }
 0x41b   :  { %v138_v50 = vsub.f32 %v2970_v61, %v118_v63 }
 0x41c   :  { %v136_v33 = vsub.f32 %v2970_v61, %v116_v3  ;;  %v82_v39 = vpop.xlane.xlu0 %81 }
 0x41d   :  { %v2975_v30 = vmul.f32 0.5, %v82_v39  ;;  %v79_v13 = vpop.xlane.xlu1 %78 }
 0x41e   :  { %v119_v54 = vmul.f32 0.5, %v79_v13  ;;  %1689 = vrot.lane.b32.xlu1 %v136_v33, %s2276_s25 }
 0x41f   :  { %v140_v51 = vsub.f32 %v2970_v61, %v2975_v30 }
 0x420   :  { %v139_v45 = vsub.f32 %v2970_v61, %v119_v54  ;;  %v88_v38 = vpop.xlane.xlu0 %87 }
 0x421   :  { %v2982_v7 = vmul.f32 0.5, %v88_v38  ;;  %v85_v21 = vpop.xlane.xlu1 %84 }
 0x422   :  { %v2984_v0 = vmul.f32 0.5, %v85_v21  ;;  %1693 = vrot.lane.b32.xlu1 %v138_v50, %s2276_s25  ;;  %1695 = vrot.lane.b32.xlu0 %v139_v45, %s2276_s25 }
 0x423   :  { %v142_v4 = vsub.f32 %v2970_v61, %v2982_v7 }
 0x424   :  { %v141_v24 = vsub.f32 %v2970_v61, %v2984_v0  ;;  %v94_v5 = vpop.xlane.xlu0 %93 }
 0x425   :  { %v2992_v6 = vmul.f32 0.5, %v94_v5  ;;  %v91_v55 = vpop.xlane.xlu1 %90 }
 0x426   :  { %v2994_v12 = vmul.f32 0.5, %v91_v55 }
 0x427   :  { %v144_v56 = vsub.f32 %v2970_v61, %v2992_v6 }
 0x428   :  { %v143_v57 = vsub.f32 %v2970_v61, %v2994_v12  ;;  %v103_v36 = vpop.xlane.xlu0 %102 }
 0x429   :  { %v3000_v31 = vmul.f32 0.5, %v103_v36  ;;  %v97_v9 = vpop.xlane.xlu1 %96 }
 0x42a   :  { %v3002_v28 = vmul.f32 0.5, %v97_v9 }
 0x42b   :  { %v147_v60 = vsub.f32 %v2970_v61, %v3000_v31 }
 0x42c   :  { %v145_v29 = vsub.f32 %v2970_v61, %v3002_v28  ;;  %v106_v48 = vpop.xlane.xlu0 %105 }
 0x42d   :  { %v3008_v58 = vmul.f32 0.5, %v106_v48  ;;  %v100_v8 = vpop.xlane.xlu1 %99 }
 0x42e   :  { %v3010_v62 = vmul.f32 0.5, %v100_v8 }
 0x42f   :  { %v148_v18 = vsub.f32 %v2970_v61, %v3008_v58 }
 0x430   :  { %v146_v37 = vsub.f32 %v2970_v61, %v3010_v62  ;;  %v112_v26 = vpop.xlane.xlu0 %111 }
 0x431   :  { %v3016_v1 = vmul.f32 0.5, %v112_v26  ;;  %v109_v14 = vpop.xlane.xlu1 %108 }
 0x432   :  { %v3018_v27 = vmul.f32 0.5, %v109_v14 }
 0x433   :  { %v150_v2 = vsub.f32 %v2970_v61, %v3016_v1 }
 0x434   :  { %v149_v34 = vsub.f32 %v2970_v61, %v3018_v27  ;;  %v1528_v53 = vpop.permute.xlu0 %1527 }
 0x435   :  { %1576 = vst.msk [vmem:[#allocation2] sm:$0xff] %vm1575_vm4, %v1528_v53  ;;  %v115_v52 = vpop.xlane.xlu1 %114 }
 0x436   :  { %v3025_v41 = vmul.f32 0.5, %v115_v52 }
 0x438   :  { %v151_v40 = vsub.f32 %v2970_v61, %v3025_v41  ;;  %v1534_v16 = vpop.permute.xlu0 %1533 }
 0x439   :  { %1579 = vst.msk [vmem:[#allocation2 + $0x18] sm:$0xff] %vm1575_vm4, %v1534_v16  ;;  %v1530_v43 = vpop.permute.xlu1 %1529 }
 0x43a   :  { %1577 = vst.msk [vmem:[#allocation2 + $0x8] sm:$0xff] %vm1575_vm4, %v1530_v43 }
 0x43c   :  { %v1538_v15 = vpop.permute.xlu0 %1537 }
 0x43d   :  { %1581 = vst.msk [vmem:[#allocation2 + $0x28] sm:$0xff] %vm1575_vm4, %v1538_v15  ;;  %v1532_v19 = vpop.permute.xlu1 %1531 }
 0x43e   :  { %1578 = vst.msk [vmem:[#allocation2 + $0x10] sm:$0xff] %vm1575_vm4, %v1532_v19 }
 0x440   :  { %v1542_v10 = vpop.permute.xlu0 %1541 }
 0x441   :  { %1583 = vst.msk [vmem:[#allocation2 + $0x38] sm:$0xff] %vm1575_vm4, %v1542_v10  ;;  %v1536_v22 = vpop.permute.xlu1 %1535 }
 0x442   :  { %1580 = vst.msk [vmem:[#allocation2 + $0x20] sm:$0xff] %vm1575_vm4, %v1536_v22 }
 0x444   :  { %v1546_v11 = vpop.permute.xlu0 %1545 }
 0x445   :  { %1585 = vst.msk [vmem:[#allocation2 + $0x48] sm:$0xff] %vm1575_vm4, %v1546_v11  ;;  %v1540_v49 = vpop.permute.xlu1 %1539 }
 0x446   :  { %1582 = vst.msk [vmem:[#allocation2 + $0x30] sm:$0xff] %vm1575_vm4, %v1540_v49 }
 0x448   :  { %v1550_v59 = vpop.permute.xlu0 %1549 }
 0x449   :  { %1587 = vst.msk [vmem:[#allocation2 + $0x58] sm:$0xff] %vm1575_vm4, %v1550_v59  ;;  %v1544_v25 = vpop.permute.xlu1 %1543 }
 0x44a   :  { %1584 = vst.msk [vmem:[#allocation2 + $0x40] sm:$0xff] %vm1575_vm4, %v1544_v25 }
 0x44c   :  { %v1554_v44 = vpop.permute.xlu0 %1553 }
 0x44d   :  { %1589 = vst.msk [vmem:[#allocation2 + $0x68] sm:$0xff] %vm1575_vm4, %v1554_v44  ;;  %v1548_v46 = vpop.permute.xlu1 %1547 }
 0x44e   :  { %1586 = vst.msk [vmem:[#allocation2 + $0x50] sm:$0xff] %vm1575_vm4, %v1548_v46 }
 0x450   :  { %v1558_v32 = vpop.permute.xlu0 %1557 }
 0x451   :  { %1591 = vst.msk [vmem:[#allocation2 + $0x78] sm:$0xff] %vm1575_vm4, %v1558_v32  ;;  %v1552_v47 = vpop.permute.xlu1 %1551 }
 0x452   :  { %1588 = vst.msk [vmem:[#allocation2 + $0x60] sm:$0xff] %vm1575_vm4, %v1552_v47 }
 0x455   :  { %v1556_v35 = vpop.permute.xlu1 %1555 }
 0x456   :  { %1590 = vst.msk [vmem:[#allocation2 + $0x70] sm:$0xff] %vm1575_vm4, %v1556_v35 }
 0x483   :  { %v2089_v63 = vpop.f32.mrf.mxu0 }
 0x484   :  { %v1250_v3 = vadd.f32 %v2089_v63, %v2494_v17 }
 0x485   :  { %v1244_v33 = vpop.f32.mrf.mxu0 }
 0x486   :  { %2218 = vtanh.f32 %v1250_v3  ;;  %v1245_v39 = vadd.f32 %v1244_v33, %v2494_v17 }
 0x487   :  { %v2092_v13 = vpop.f32.mrf.mxu0 }
 0x488   :  { %2220 = vtanh.f32 %v1245_v39  ;;  %v1260_v50 = vadd.f32 %v2092_v13, %v2494_v17 }
 0x489   :  { %v1254_v54 = vpop.f32.mrf.mxu0 }
 0x48a   :  { %2222 = vtanh.f32 %v1260_v50  ;;  %v1255_v45 = vadd.f32 %v1254_v54, %v2494_v17 }
 0x48b   :  { %v2095_v38 = vpop.f32.mrf.mxu0  ;;  %v3114_v0 = vpop.permute.xlu0 %1691 }
 0x48c   :  { %2224 = vtanh.f32 %v1255_v45  ;;  %v1270_v21 = vadd.f32 %v2095_v38, %v2494_v17 }
 0x48d   :  { %v1264_v5 = vpop.f32.mrf.mxu0 }
 0x48e   :  { %2226 = vtanh.f32 %v1270_v21  ;;  %v1265_v55 = vadd.f32 %v1264_v5, %v2494_v17 }
 0x48f   :  { %v2098_v36 = vpop.f32.mrf.mxu0 }
 0x490   :  { %2228 = vtanh.f32 %v1265_v55  ;;  %v1280_v9 = vadd.f32 %v2098_v36, %v2494_v17 }
 0x491   :  { %v1274_v48 = vpop.f32.mrf.mxu0 }
 0x492   :  { %2230 = vtanh.f32 %v1280_v9  ;;  %v1275_v8 = vadd.f32 %v1274_v48, %v2494_v17 }
 0x493   :  { %v2219_v26 = vpop.eup %2218  ;;  %v2101_v14 = vpop.f32.mrf.mxu0 }
 0x494   :  { %2232 = vtanh.f32 %v1275_v8  ;;  %v1290_v53 = vadd.f32 %v2101_v14, %v2494_v17  ;;  %v1348_v52 = vmul.f32 %v2219_v26, %v2961_v20 }
 0x495   :  { %v2221_v16 = vpop.eup %2220  ;;  %v1284_v43 = vpop.f32.mrf.mxu0 }
 0x496   :  { %2234 = vtanh.f32 %v1290_v53  ;;  %v1285_v15 = vadd.f32 %v1284_v43, %v2494_v17  ;;  %1381 = vrot.lane.b32.xlu1 %v1348_v52, %s2273_s1  ;;  %v1347_v19 = vmul.f32 %v2221_v16, %v2961_v20 }
 0x497   :  { %v2223_v10 = vpop.eup %2222  ;;  %v2104_v22 = vpop.f32.mrf.mxu0 }
 0x498   :  { %2236 = vtanh.f32 %v1285_v15  ;;  %v1300_v11 = vadd.f32 %v2104_v22, %v2494_v17  ;;  %1379 = vrot.lane.b32.xlu0 %v1347_v19, %s2273_s1  ;;  %v1350_v44 = vmul.f32 %v2223_v10, %v2961_v20 }
 0x499   :  { %v2225_v49 = vpop.eup %2224  ;;  %v1294_v59 = vpop.f32.mrf.mxu0 }
 0x49a   :  { %2238 = vtanh.f32 %v1300_v11  ;;  %v1295_v25 = vadd.f32 %v1294_v59, %v2494_v17  ;;  %v1349_v46 = vmul.f32 %v2225_v49, %v2961_v20 }
 0x49b   :  { %v2227_v32 = vpop.eup %2226  ;;  %v2107_v47 = vpop.f32.mrf.mxu0 }
 0x49c   :  { %2240 = vtanh.f32 %v1295_v25  ;;  %v1310_v35 = vadd.f32 %v2107_v47, %v2494_v17  ;;  %1385 = vrot.lane.b32.xlu0 %v1350_v44, %s2273_s1  ;;  %1383 = vrot.lane.b32.xlu1 %v1349_v46, %s2273_s1  ;;  %v1352_v39 = vmul.f32 %v2227_v32, %v2961_v20 }
 0x49d   :  { %v2229_v63 = vpop.eup %2228  ;;  %v1304_v3 = vpop.f32.mrf.mxu0 }
 0x49e   :  { %2242 = vtanh.f32 %v1310_v35  ;;  %v1305_v33 = vadd.f32 %v1304_v3, %v2494_v17  ;;  %v1351_v13 = vmul.f32 %v2229_v63, %v2961_v20 }
 0x49f   :  { %v2231_v50 = vpop.eup %2230  ;;  %v2110_v54 = vpop.f32.mrf.mxu0 }
 0x4a0   :  { %2244 = vtanh.f32 %v1305_v33  ;;  %v1320_v45 = vadd.f32 %v2110_v54, %v2494_v17  ;;  %1389 = vrot.lane.b32.xlu0 %v1352_v39, %s2273_s1  ;;  %1387 = vrot.lane.b32.xlu1 %v1351_v13, %s2273_s1  ;;  %v1354_v55 = vmul.f32 %v2231_v50, %v2961_v20 }
 0x4a1   :  { %v2233_v38 = vpop.eup %2232  ;;  %v1314_v21 = vpop.f32.mrf.mxu0 }
 0x4a2   :  { %2246 = vtanh.f32 %v1320_v45  ;;  %v1315_v5 = vadd.f32 %v1314_v21, %v2494_v17  ;;  %v1353_v36 = vmul.f32 %v2233_v38, %v2961_v20 }
 0x4a3   :  { %v2235_v9 = vpop.eup %2234 }
 0x4a4   :  { %2248 = vtanh.f32 %v1315_v5  ;;  %1393 = vrot.lane.b32.xlu0 %v1354_v55, %s2273_s1  ;;  %1391 = vrot.lane.b32.xlu1 %v1353_v36, %s2273_s1  ;;  %v1356_v8 = vmul.f32 %v2235_v9, %v2961_v20 }
 0x4a5   :  { %v2237_v48 = vpop.eup %2236 }
 0x4a6   :  { %v1355_v26 = vmul.f32 %v2237_v48, %v2961_v20 }
 0x4a7   :  { %v2239_v14 = vpop.eup %2238 }
 0x4a8   :  { %1397 = vrot.lane.b32.xlu0 %v1356_v8, %s2273_s1  ;;  %1395 = vrot.lane.b32.xlu1 %v1355_v26, %s2273_s1  ;;  %v1358_v53 = vmul.f32 %v2239_v14, %v2961_v20 }
 0x4a9   :  { %v2241_v17 = vpop.eup %2240 }
 0x4aa   :  { %v1357_v52 = vmul.f32 %v2241_v17, %v2961_v20 }
 0x4ab   :  { %v2243_v16 = vpop.eup %2242 }
 0x4ac   :  { %1401 = vrot.lane.b32.xlu0 %v1358_v53, %s2273_s1  ;;  %1399 = vrot.lane.b32.xlu1 %v1357_v52, %s2273_s1  ;;  %v1360_v15 = vmul.f32 %v2243_v16, %v2961_v20 }
 0x4ad   :  { %v2245_v43 = vpop.eup %2244 }
 0x4ae   :  { %v1359_v19 = vmul.f32 %v2245_v43, %v2961_v20 }
 0x4af   :  { %v2247_v10 = vpop.eup %2246 }
 0x4b0   :  { %1405 = vrot.lane.b32.xlu0 %v1360_v15, %s2273_s1  ;;  %1403 = vrot.lane.b32.xlu1 %v1359_v19, %s2273_s1  ;;  %v1362_v11 = vmul.f32 %v2247_v10, %v2961_v20 }
 0x4b1   :  { %v2249_v22 = vpop.eup %2248 }
 0x4b2   :  { %v1361_v49 = vmul.f32 %v2249_v22, %v2961_v20  ;;  %v3112_v20 = vpop.permute.xlu1 %1689 }
 0x4b4   :  { %1409 = vrot.lane.b32.xlu0 %v1362_v11, %s2273_s1  ;;  %1407 = vrot.lane.b32.xlu1 %v1361_v49, %s2273_s1 }
 0x4b6   :  { %v3116_v30 = vpop.permute.xlu1 %1693 }
 0x4b8   :  { %1699 = vrot.lane.b32.xlu0 %v141_v24, %s2276_s25  ;;  %1697 = vrot.lane.b32.xlu1 %v140_v51, %s2276_s25  ;;  %v3118_v51 = vpop.permute.xlu0 %1695 }
 0x4bc   :  { %1703 = vrot.lane.b32.xlu0 %v143_v57, %s2276_s25  ;;  %1701 = vrot.lane.b32.xlu1 %v142_v4, %s2276_s25 }
 0x4c0   :  { %1705 = vrot.lane.b32.xlu1 %v144_v56, %s2276_s25 }
 0x508   :  { %v1382_v24 = vpop.permute.xlu1 %1381 }
 0x509   :  { %v1430_v12 = vsel %vm376_vm1, %v1382_v24, 0.0 }
 0x50a   :  { %1431 = vadd.xlane.f32.xlu1 %v1430_v12  ;;  %v1380_v57 = vpop.permute.xlu0 %1379 }
 0x50b   :  { %v1427_v7 = vsel %vm376_vm1, %v1380_v57, 0.0 }
 0x50c   :  { %1428 = vadd.xlane.f32.xlu0 %v1427_v7 }
 0x50e   :  { %v1384_v4 = vpop.permute.xlu1 %1383  ;;  %v1386_v59 = vpop.permute.xlu0 %1385 }
 0x50f   :  { %v1433_v6 = vsel %vm376_vm1, %v1384_v4, 0.0  ;;  %v1436_v56 = vsel %vm376_vm1, %v1386_v59, 0.0 }
 0x510   :  { %1434 = vadd.xlane.f32.xlu0 %v1433_v6  ;;  %1437 = vadd.xlane.f32.xlu1 %v1436_v56 }
 0x512   :  { %v1388_v25 = vpop.permute.xlu1 %1387  ;;  %v1390_v44 = vpop.permute.xlu0 %1389 }
 0x513   :  { %v1439_v46 = vsel %vm376_vm1, %v1388_v25, 0.0  ;;  %v1442_v32 = vsel %vm376_vm1, %v1390_v44, 0.0 }
 0x514   :  { %1440 = vadd.xlane.f32.xlu0 %v1439_v46  ;;  %1443 = vadd.xlane.f32.xlu1 %v1442_v32 }
 0x516   :  { %v1392_v47 = vpop.permute.xlu1 %1391  ;;  %v1394_v35 = vpop.permute.xlu0 %1393 }
 0x517   :  { %v1445_v63 = vsel %vm376_vm1, %v1392_v47, 0.0  ;;  %v1448_v3 = vsel %vm376_vm1, %v1394_v35, 0.0 }
 0x518   :  { %1446 = vadd.xlane.f32.xlu0 %v1445_v63  ;;  %1449 = vadd.xlane.f32.xlu1 %v1448_v3 }
 0x51a   :  { %v1396_v33 = vpop.permute.xlu1 %1395  ;;  %v1398_v39 = vpop.permute.xlu0 %1397 }
 0x51b   :  { %v1451_v13 = vsel %vm376_vm1, %v1396_v33, 0.0  ;;  %v1454_v50 = vsel %vm376_vm1, %v1398_v39, 0.0 }
 0x51c   :  { %1452 = vadd.xlane.f32.xlu0 %v1451_v13  ;;  %1455 = vadd.xlane.f32.xlu1 %v1454_v50 }
 0x51e   :  { %v1400_v54 = vpop.permute.xlu1 %1399  ;;  %v1402_v45 = vpop.permute.xlu0 %1401 }
 0x51f   :  { %v1457_v38 = vsel %vm376_vm1, %v1400_v54, 0.0  ;;  %v1460_v21 = vsel %vm376_vm1, %v1402_v45, 0.0 }
 0x520   :  { %1458 = vadd.xlane.f32.xlu0 %v1457_v38  ;;  %1461 = vadd.xlane.f32.xlu1 %v1460_v21 }
 0x522   :  { %v1404_v5 = vpop.permute.xlu1 %1403  ;;  %v1406_v55 = vpop.permute.xlu0 %1405 }
 0x523   :  { %v1463_v36 = vsel %vm376_vm1, %v1404_v5, 0.0  ;;  %v1466_v9 = vsel %vm376_vm1, %v1406_v55, 0.0 }
 0x524   :  { %1464 = vadd.xlane.f32.xlu0 %v1463_v36  ;;  %1467 = vadd.xlane.f32.xlu1 %v1466_v9 }
 0x526   :  { %v1408_v48 = vpop.permute.xlu1 %1407  ;;  %v1410_v8 = vpop.permute.xlu0 %1409 }
 0x527   :  { %v1469_v26 = vsel %vm376_vm1, %v1408_v48, 0.0  ;;  %v1472_v14 = vsel %vm376_vm1, %v1410_v8, 0.0 }
 0x528   :  { %1470 = vadd.xlane.f32.xlu0 %v1469_v26  ;;  %1473 = vadd.xlane.f32.xlu1 %v1472_v14 }
 0x52a   :  { %v3156_v62 = vpop.permute.xlu1 %1697  ;;  %v3160_v58 = vpop.permute.xlu0 %1699 }
 0x52e   :  { %v3166_v17 = vpop.permute.xlu0 %1703 }
 0x539   :  { %1709 = vrot.lane.b32.xlu1 %v146_v37, %s2276_s25  ;;  %v3158_v37 = vpop.permute.xlu1 %1701 }
 0x53d   :  { %1713 = vrot.lane.b32.xlu1 %v148_v18, %s2276_s25  ;;  %v1477_v18 = vsub.s32 5, %v2403_v23  ;;  %v3163_v28 = vpop.permute.xlu1 %1705 }
 0x53e   :  { %1707 = vrot.lane.b32.xlu0 %v145_v29, %s2276_s25 }
 0x53f   :  { %v1478_v29 = vrot.slane %v2967_v42, %v1477_v18 }
 0x542   :  { %1711 = vrot.lane.b32.xlu0 %v147_v60, %s2276_s25 }
 0x546   :  { %1715 = vrot.lane.b32.xlu0 %v149_v34, %s2276_s25 }
 0x593   :  { %v1432_v31 = vpop.xlane.xlu1 %1431 }
 0x594   :  { %v1480_v60 = vadd.f32 %v1478_v29, %v1432_v31 }
 0x595   :  { %v1429_v53 = vpop.xlane.xlu0 %1428 }
 0x596   :  { %v1479_v52 = vadd.f32 %v1478_v29, %v1429_v53  ;;  %1610 = vrot.lane.b32.xlu0 %v1480_v60, %s2277_s3 }
 0x598   :  { %1608 = vrot.lane.b32.xlu1 %v1479_v52, %s2277_s3 }
 0x599   :  { %v1438_v27 = vpop.xlane.xlu1 %1437  ;;  %v1435_v34 = vpop.xlane.xlu0 %1434 }
 0x59a   :  { %v1482_v16 = vadd.f32 %v1478_v29, %v1438_v27  ;;  %v1481_v43 = vadd.f32 %v1478_v29, %v1435_v34 }
 0x59c   :  { %1614 = vrot.lane.b32.xlu0 %v1482_v16, %s2277_s3  ;;  %1612 = vrot.lane.b32.xlu1 %v1481_v43, %s2277_s3 }
 0x59d   :  { %v1444_v23 = vpop.xlane.xlu1 %1443  ;;  %v1441_v42 = vpop.xlane.xlu0 %1440 }
 0x59e   :  { %v1484_v15 = vadd.f32 %v1478_v29, %v1444_v23  ;;  %v1483_v19 = vadd.f32 %v1478_v29, %v1441_v42 }
 0x5a0   :  { %1618 = vrot.lane.b32.xlu0 %v1484_v15, %s2277_s3  ;;  %1616 = vrot.lane.b32.xlu1 %v1483_v19, %s2277_s3 }
 0x5a1   :  { %v1450_v10 = vpop.xlane.xlu1 %1449  ;;  %v1447_v22 = vpop.xlane.xlu0 %1446 }
 0x5a2   :  { %v1486_v11 = vadd.f32 %v1478_v29, %v1450_v10  ;;  %v1485_v49 = vadd.f32 %v1478_v29, %v1447_v22 }
 0x5a4   :  { %1622 = vrot.lane.b32.xlu0 %v1486_v11, %s2277_s3  ;;  %1620 = vrot.lane.b32.xlu1 %v1485_v49, %s2277_s3 }
 0x5a5   :  { %v1456_v24 = vpop.xlane.xlu1 %1455  ;;  %v1453_v12 = vpop.xlane.xlu0 %1452 }
 0x5a6   :  { %v1488_v57 = vadd.f32 %v1478_v29, %v1456_v24  ;;  %v1487_v7 = vadd.f32 %v1478_v29, %v1453_v12 }
 0x5a8   :  { %1626 = vrot.lane.b32.xlu0 %v1488_v57, %s2277_s3  ;;  %1624 = vrot.lane.b32.xlu1 %v1487_v7, %s2277_s3 }
 0x5a9   :  { %v1462_v4 = vpop.xlane.xlu1 %1461  ;;  %v1459_v59 = vpop.xlane.xlu0 %1458 }
 0x5aa   :  { %v1490_v6 = vadd.f32 %v1478_v29, %v1462_v4  ;;  %v1489_v56 = vadd.f32 %v1478_v29, %v1459_v59 }
 0x5ac   :  { %1630 = vrot.lane.b32.xlu0 %v1490_v6, %s2277_s3  ;;  %1628 = vrot.lane.b32.xlu1 %v1489_v56, %s2277_s3 }
 0x5ad   :  { %v1468_v25 = vpop.xlane.xlu1 %1467  ;;  %v1465_v44 = vpop.xlane.xlu0 %1464 }
 0x5ae   :  { %v1492_v46 = vadd.f32 %v1478_v29, %v1468_v25  ;;  %v1491_v32 = vadd.f32 %v1478_v29, %v1465_v44 }
 0x5b0   :  { %1634 = vrot.lane.b32.xlu0 %v1492_v46, %s2277_s3  ;;  %1632 = vrot.lane.b32.xlu1 %v1491_v32, %s2277_s3 }
 0x5b1   :  { %v1474_v47 = vpop.xlane.xlu1 %1473  ;;  %v1471_v35 = vpop.xlane.xlu0 %1470 }
 0x5b2   :  { %v1494_v63 = vadd.f32 %v1478_v29, %v1474_v47  ;;  %v1493_v3 = vadd.f32 %v1478_v29, %v1471_v35 }
 0x5b4   :  { %1638 = vrot.lane.b32.xlu0 %v1494_v63, %s2277_s3  ;;  %1636 = vrot.lane.b32.xlu1 %v1493_v3, %s2277_s3 }
 0x5b5   :  { %v1708_v33 = vpop.permute.xlu0 %1707  ;;  %v1710_v13 = vpop.permute.xlu1 %1709 }
 0x5b8   :  { %1719 = vrot.lane.b32.xlu0 %v151_v40, %s2276_s25  ;;  %1717 = vrot.lane.b32.xlu1 %v150_v2, %s2276_s25 }
 0x5b9   :  { %v1712_v39 = vpop.permute.xlu0 %1711  ;;  %v1714_v54 = vpop.permute.xlu1 %1713 }
 0x5bd   :  { %v1716_v50 = vpop.permute.xlu0 %1715 }
 0x608   :  { %v1611_v45 = vpop.permute.xlu0 %1610 }
 0x609   :  { %1658 = vst.msk [vmem:[#allocation2 + $0x8] sm:$0xff] %vm1656_vm5, %v1611_v45 }
 0x60a   :  { %1739 = vst.msk [vmem:[#allocation2 + $0x8] sm:$0xff] %vm1737_vm6, %v3114_v0  ;;  %v1609_v41 = vpop.permute.xlu1 %1608 }
 0x60b   :  { %1657 = vst.msk [vmem:[#allocation2] sm:$0xff] %vm1656_vm5, %v1609_v41 }
 0x60c   :  { %1738 = vst.msk [vmem:[#allocation2] sm:$0xff] %vm1737_vm6, %v3112_v20 }
 0x60e   :  { %v1613_v61 = vpop.permute.xlu1 %1612  ;;  %v1615_v1 = vpop.permute.xlu0 %1614 }
 0x60f   :  { %1659 = vst.msk [vmem:[#allocation2 + $0x10] sm:$0xff] %vm1656_vm5, %v1613_v61  ;;  %1660 = vst.msk [vmem:[#allocation2 + $0x18] sm:$0xff] %vm1656_vm5, %v1615_v1 }
 0x610   :  { %1740 = vst.msk [vmem:[#allocation2 + $0x10] sm:$0xff] %vm1737_vm6, %v3116_v30  ;;  %1741 = vst.msk [vmem:[#allocation2 + $0x18] sm:$0xff] %vm1737_vm6, %v3118_v51 }
 0x612   :  { %v1617_v2 = vpop.permute.xlu1 %1616  ;;  %v1619_v40 = vpop.permute.xlu0 %1618 }
 0x613   :  { %1661 = vst.msk [vmem:[#allocation2 + $0x20] sm:$0xff] %vm1656_vm5, %v1617_v2  ;;  %1662 = vst.msk [vmem:[#allocation2 + $0x28] sm:$0xff] %vm1656_vm5, %v1619_v40 }
 0x614   :  { %1742 = vst.msk [vmem:[#allocation2 + $0x20] sm:$0xff] %vm1737_vm6, %v3156_v62  ;;  %1743 = vst.msk [vmem:[#allocation2 + $0x28] sm:$0xff] %vm1737_vm6, %v3160_v58 }
 0x616   :  { %v1621_v20 = vpop.permute.xlu1 %1620  ;;  %v1623_v0 = vpop.permute.xlu0 %1622 }
 0x617   :  { %1663 = vst.msk [vmem:[#allocation2 + $0x30] sm:$0xff] %vm1656_vm5, %v1621_v20  ;;  %1664 = vst.msk [vmem:[#allocation2 + $0x38] sm:$0xff] %vm1656_vm5, %v1623_v0 }
 0x618   :  { %1744 = vst.msk [vmem:[#allocation2 + $0x30] sm:$0xff] %vm1737_vm6, %v3158_v37  ;;  %1745 = vst.msk [vmem:[#allocation2 + $0x38] sm:$0xff] %vm1737_vm6, %v3166_v17 }
 0x61a   :  { %v1625_v30 = vpop.permute.xlu1 %1624  ;;  %v1627_v51 = vpop.permute.xlu0 %1626 }
 0x61b   :  { %1665 = vst.msk [vmem:[#allocation2 + $0x40] sm:$0xff] %vm1656_vm5, %v1625_v30  ;;  %1666 = vst.msk [vmem:[#allocation2 + $0x48] sm:$0xff] %vm1656_vm5, %v1627_v51 }
 0x61c   :  { %1746 = vst.msk [vmem:[#allocation2 + $0x40] sm:$0xff] %vm1737_vm6, %v3163_v28  ;;  %1747 = vst.msk [vmem:[#allocation2 + $0x48] sm:$0xff] %vm1737_vm6, %v1708_v33 }
 0x61e   :  { %v1629_v38 = vpop.permute.xlu1 %1628  ;;  %v1631_v21 = vpop.permute.xlu0 %1630 }
 0x61f   :  { %1667 = vst.msk [vmem:[#allocation2 + $0x50] sm:$0xff] %vm1656_vm5, %v1629_v38  ;;  %1668 = vst.msk [vmem:[#allocation2 + $0x58] sm:$0xff] %vm1656_vm5, %v1631_v21 }
 0x620   :  { %1748 = vst.msk [vmem:[#allocation2 + $0x50] sm:$0xff] %vm1737_vm6, %v1710_v13  ;;  %1749 = vst.msk [vmem:[#allocation2 + $0x58] sm:$0xff] %vm1737_vm6, %v1712_v39 }
 0x622   :  { %v1633_v5 = vpop.permute.xlu1 %1632  ;;  %v1635_v55 = vpop.permute.xlu0 %1634 }
 0x623   :  { %1669 = vst.msk [vmem:[#allocation2 + $0x60] sm:$0xff] %vm1656_vm5, %v1633_v5  ;;  %1670 = vst.msk [vmem:[#allocation2 + $0x68] sm:$0xff] %vm1656_vm5, %v1635_v55 }
 0x624   :  { %1750 = vst.msk [vmem:[#allocation2 + $0x60] sm:$0xff] %vm1737_vm6, %v1714_v54  ;;  %1751 = vst.msk [vmem:[#allocation2 + $0x68] sm:$0xff] %vm1737_vm6, %v1716_v50 }
 0x626   :  { %v1637_v36 = vpop.permute.xlu1 %1636  ;;  %v1639_v9 = vpop.permute.xlu0 %1638 }
 0x627   :  { %1671 = vst.msk [vmem:[#allocation2 + $0x70] sm:$0xff] %vm1656_vm5, %v1637_v36  ;;  %1672 = vst.msk [vmem:[#allocation2 + $0x78] sm:$0xff] %vm1656_vm5, %v1639_v9 }
 0x62a   :  { %v1718_v48 = vpop.permute.xlu1 %1717  ;;  %v1720_v8 = vpop.permute.xlu0 %1719 }
 0x62b   :  { %1752 = vst.msk [vmem:[#allocation2 + $0x70] sm:$0xff] %vm1737_vm6, %v1718_v48  ;;  %1753 = vst.msk [vmem:[#allocation2 + $0x78] sm:$0xff] %vm1737_vm6, %v1720_v8 }
 0x62c   :  { %2262 = shalt.err (!%p2259_p4)
}
 0x62d   :  { %s2279_s0 = smov 128  }
 0x62e   :  { %1765 = dma.vmem_to_hbm [thread:$0]  %s1760_s27, 2048, %s3241_s4, [#allocation3], %s2279_s0, %s2279_s0, %s2277_s3  }
 0x62f   :  { %2271 = dma.done.wait [#allocation3], 2048  }
 0x630   :  { %2272 = vsyncadd [#allocation3], 4294965248 }
 0x631   :  { %1769 = vsyncpa [#allocation3], 1 }

</bundles_post_ra>
